<compile_context>
chip_gen: v7x
topology: tpu7x:2x2x1
jax: 0.10.0
libtpu: 0.0.40
codegen_flags: <defaults>
</compile_context>

<pallas_src>
import functools

import numpy as np
import jax
import jax.numpy as jnp
from jax.experimental import pallas as pl
from jax.experimental.pallas import tpu as pltpu


# --------------------------------------------------------------------------
# Fused Pallas kernel: `bpt` whole batch elements (bpt*H rows) per grid step.
# --------------------------------------------------------------------------
def _elu(z):
    # ELU(z) = z for z > 0 else exp(z) - 1.  exp(min(z,0)) keeps EUP args <= 0.
    # (expm1 semantics; difference is a few ULPs, well inside the bf16 budget.)
    return jnp.where(z > 0.0, z, jnp.exp(jnp.minimum(z, 0.0)) - 1.0)


def _srrn_kernel(x_ref, wsc_ref, rsh_ref, p0_ref, p1_ref, p2_ref,
                 r0_ref, c0_ref, r1_ref, c1_ref, r2_ref, csh2_ref,
                 fw_ref, fb_ref, ba_ref, a_ref, o_ref, *, C, H, bpt):
    f32, bf16 = jnp.float32, jnp.bfloat16

    # Per-channel activation slabs, each (M, W) with M = bpt * H rows
    # (whole batch sub-slabs folded into the MXU M dimension).
    xs = [x_ref[c] for c in range(C)]

    # ---- refinement stages: 1x1 conv as a VPU scalar-weight channel combine
    #      (+BN fold, ReLU), AvgPool (1,2) as a small (W, W/2) MXU matmul ----
    pools = (p0_ref, p1_ref, p2_ref)
    ref3 = None
    for i in range(4):
        ys = []
        for o in range(C):
            acc = wsc_ref[(i * C + o) * C + 0] * xs[0]
            for c in range(1, C):
                acc = acc + wsc_ref[(i * C + o) * C + c] * xs[c]
            ys.append(jnp.maximum(acc + rsh_ref[i * C + o], 0.0))
        if i < 3:
            P = pools[i][...]
            xs = [jnp.dot(y.astype(bf16), P, preferred_element_type=f32)
                  for y in ys]
            if i == 2:
                ref3 = xs            # refinement_outputs[-1] (post-pool, W/8)
        else:
            xs = ys                  # stage 3: no pooling

    # ---- reconstruction stage 0: ConvTranspose (per input channel block of
    #      the banded matrix) + BN + ELU ------------------------------------
    acc = jnp.dot(xs[0].astype(bf16), r0_ref[0], preferred_element_type=f32)
    for c in range(1, C):
        acc = acc + jnp.dot(xs[c].astype(bf16), r0_ref[c],
                            preferred_element_type=f32)
    rec = _elu(acc + c0_ref[...])

    # ---- reconstruction stage 1: one banded-matrix matmul ------------------
    rec = _elu(jnp.dot(rec.astype(bf16), r1_ref[...],
                       preferred_element_type=f32) + c1_ref[...])

    # ---- reconstruction stage 2: per OUTPUT channel so the channels stay
    #      separate for the (scalar) final 1x1 conv combine ------------------
    rec_bf = rec.astype(bf16)
    recs = [_elu(jnp.dot(rec_bf, r2_ref[o], preferred_element_type=f32)
                 + csh2_ref[o]) for o in range(C)]

    # ---- final conv (scalar channel combine) + bilinear upsample + residual
    #      + adaptive W pool: two small matmuls + scalar bias -----------------
    fr = fw_ref[0] * ref3[0]
    fc = fw_ref[0] * recs[0]
    for c in range(1, C):
        fr = fr + fw_ref[c] * ref3[c]
        fc = fc + fw_ref[c] * recs[c]
    conv = (jnp.dot(fr.astype(bf16), ba_ref[...], preferred_element_type=f32)
            + jnp.dot(fc.astype(bf16), a_ref[...], preferred_element_type=f32)
            + fb_ref[0])                                   # (bpt*H, t)

    # AdaptiveAvgPool over H (full height -> 1 row) per batch element.
    t = conv.shape[-1]
    o_ref[0] = jnp.mean(conv.reshape(bpt, H, t), axis=1)   # (bpt, t)


def _pick_batch_per_tile(N, H, max_rows=256):
    """Largest batch-elements-per-tile d | N such that rows = d*H is sublane
    aligned (or spans the full array), fits `max_rows`, and (when possible)
    leaves >= 2 grid blocks so both v7x TensorCores get work."""
    for need_two in (True, False):
        cands = [d for d in range(1, N + 1)
                 if N % d == 0
                 and d * H <= max_rows
                 and ((d * H) % 8 == 0 or d == N)
                 and (N // d >= 2 or not need_two)]
        if cands:
            return max(cands)
    return N


def srrn_forward_pallas(x_nchw, model, *, max_rows=256):
    N, C, H, W = x_nchw.shape
    t = model["T_final"]
    bpt = _pick_batch_per_tile(N, H, max_rows)
    nblk = N // bpt

    # (N, C, H, W) -> (C, N*H, W) bf16: per-channel slabs, batch*height folded
    # into the matmul M dimension.  Single fused cast+transpose XLA op.
    # TODO(synk): store activations upstream in (C, N*H, W) layout to drop this
    #             transpose entirely (input HBM round trip, v5e review item).
    x3 = jnp.transpose(x_nchw.astype(jnp.bfloat16),
                       (1, 0, 2, 3)).reshape(C, N * H, W)

    w_args = [model["wsc"], model["rsh"],
              model["P"][0], model["P"][1], model["P"][2],
              model["R0"], model["c0"], model["R1"], model["c1"],
              model["R2"], model["csh2"],
              model["fw"], model["fb"], model["BA"], model["A"]]
    in_smem = [True, True, False, False, False, False, False, False, False,
               False, True, True, True, False, False]

    def spec_for(a, smem):
        if smem:
            return pl.BlockSpec(memory_space=pltpu.MemorySpace.SMEM)
        nd = a.ndim
        return pl.BlockSpec(a.shape, lambda r, _nd=nd: (0,) * _nd)

    w_specs = [spec_for(a, s) for a, s in zip(w_args, in_smem)]
    kernel = functools.partial(_srrn_kernel, C=C, H=H, bpt=bpt)

    out = pl.pallas_call(
        kernel,
        out_shape=jax.ShapeDtypeStruct((nblk, bpt, t), jnp.float32),
        grid=(nblk,),
        in_specs=[pl.BlockSpec((C, bpt * H, W), lambda r: (0, r, 0))] + w_specs,
        out_specs=pl.BlockSpec((1, bpt, t), lambda r: (r, 0, 0)),
        compiler_params=pltpu.CompilerParams(
            dimension_semantics=("parallel",),
            vmem_limit_bytes=32 * 1024 * 1024),
    )(x3, *w_args)
    return out.reshape(N, t)


# --------------------------------------------------------------------------
# Structured matrices (built once in numpy)
# --------------------------------------------------------------------------
def avgpool_matrix(w_in):
    w_out = w_in // 2
    P = np.zeros((w_in, w_out), np.float32)
    for j in range(w_out):
        P[2 * j, j] = 0.5
        P[2 * j + 1, j] = 0.5
    return P


def convtranspose_matrices(wt, w_in, stride=2, pad=1):
    # wt: (C_in, C_out, 1, K) PyTorch ConvTranspose2d weight.
    C_in, C_out, _, K = wt.shape
    w_out = (w_in - 1) * stride - 2 * pad + K
    M = np.zeros((C_in, C_out, w_in, w_out), np.float32)
    for i in range(w_in):
        for k in range(K):
            o = i * stride - pad + k
            if 0 <= o < w_out:
                M[:, :, i, o] += wt[:, :, 0, k]
    return M


def bilinear_matrix(w_in, w_out):
    # F.interpolate(mode='bilinear', align_corners=False) along W.
    B = np.zeros((w_in, w_out), np.float32)
    scale = w_in / w_out
    for j in range(w_out):
        src = max((j + 0.5) * scale - 0.5, 0.0)
        i0 = min(int(np.floor(src)), w_in - 1)
        i1 = min(i0 + 1, w_in - 1)
        l1 = src - i0
        B[i0, j] += 1.0 - l1
        B[i1, j] += l1
    return B


def adaptive_pool_matrix(w_in, w_out):
    A = np.zeros((w_in, w_out), np.float32)
    for j in range(w_out):
        s = (j * w_in) // w_out
        e = -(-((j + 1) * w_in) // w_out)
        A[s:e, j] = 1.0 / (e - s)
    return A


# --------------------------------------------------------------------------
# Deterministic model construction (raw params + kernel-ready fused arrays)
# --------------------------------------------------------------------------
def build_model(C, W, T, key):
    eps = 1e-5
    keys = iter(jax.random.split(key, 64))
    bf = jnp.bfloat16

    def bn_fold(conv_b):
        gamma = 1.0 + 0.1 * jax.random.normal(next(keys), (C,), jnp.float32)
        beta = 0.1 * jax.random.normal(next(keys), (C,), jnp.float32)
        rmean = 0.1 * jax.random.normal(next(keys), (C,), jnp.float32)
        rvar = 0.5 + 0.5 * jax.random.uniform(next(keys), (C,), jnp.float32)
        sc = gamma / jnp.sqrt(rvar + eps)
        sh = beta - rmean * sc + sc * conv_b
        return np.asarray(sc, np.float32), np.asarray(sh, np.float32)

    raw = {"refine": [], "recon": []}

    # --- refinement stages ---------------------------------------------------
    wsc = np.zeros((4, C, C), np.float32)   # BN-scale-folded 1x1 conv weights
    rsh = np.zeros((4, C), np.float32)      # BN shift (+ folded conv bias)
    P_mats = []
    w_cur = W
    for i in range(4):
        conv_w = np.asarray(0.3 * jax.random.normal(next(keys), (C, C),
                                                    jnp.float32))
        conv_b = jnp.asarray(0.1 * jax.random.normal(next(keys), (C,),
                                                     jnp.float32))
        sc, sh = bn_fold(conv_b)
        raw["refine"].append(dict(w=jnp.asarray(conv_w), sc=jnp.asarray(sc),
                                  sh=jnp.asarray(sh)))
        wsc[i] = conv_w * sc[:, None]
        rsh[i] = sh
        if i < 3:
            P_mats.append(avgpool_matrix(w_cur))
            w_cur //= 2

    # --- reconstruction stages (ConvTranspose + BN folded as banded R) -------
    R_full, sh_rec = [], []
    for i in range(3):
        ct_w = np.asarray(0.3 * jax.random.normal(next(keys), (C, C, 1, 4),
                                                  jnp.float32))
        ct_b = jnp.asarray(0.1 * jax.random.normal(next(keys), (C,),
                                                   jnp.float32))
        sc, sh = bn_fold(ct_b)
        Mmat = convtranspose_matrices(ct_w, w_cur)
        raw["recon"].append(dict(m=jnp.asarray(Mmat), sc=jnp.asarray(sc),
                                 sh=jnp.asarray(sh)))
        w_out = Mmat.shape[-1]
        R_full.append((np.transpose(Mmat, (0, 2, 1, 3))
                       * sc[None, None, :, None])
                      .reshape(C * w_cur, C * w_out).astype(np.float32))
        sh_rec.append(sh)
        w_cur = w_out

    fw = np.asarray(0.3 * jax.random.normal(next(keys), (C,), jnp.float32))
    fb = np.asarray(0.1 * jax.random.normal(next(keys), (1,), jnp.float32),
                    np.float32)

    # T bookkeeping exactly as in SRRN.__init__
    t = T
    for _ in range(3):
        t //= 2
    for _ in range(3):
        t *= 2

    ref_w = W // 8                  # width of refinement_outputs[-1]
    w_rec = w_cur                   # width of the reconstruction output
    B = bilinear_matrix(ref_w, w_rec)
    A = adaptive_pool_matrix(w_rec, t)
    BA = (B @ A).astype(np.float32)

    win0 = ref_w
    wout0 = R_full[0].shape[1] // C
    wout1 = R_full[1].shape[1] // C
    wout2 = R_full[2].shape[1] // C
    c0 = np.repeat(sh_rec[0], wout0).reshape(1, C * wout0).astype(np.float32)
    c1 = np.repeat(sh_rec[1], wout1).reshape(1, C * wout1).astype(np.float32)

    model = dict(
        wsc=jnp.asarray(wsc.reshape(-1)),
        rsh=jnp.asarray(rsh.reshape(-1)),
        P=[jnp.asarray(p, bf) for p in P_mats],
        R0=jnp.asarray(R_full[0].reshape(C, win0, C * wout0), bf),
        c0=jnp.asarray(c0),
        R1=jnp.asarray(R_full[1], bf),
        c1=jnp.asarray(c1),
        R2=jnp.asarray(R_full[2].reshape(C * wout1, C, wout2)
                       .transpose(1, 0, 2).copy(), bf),
        csh2=jnp.asarray(sh_rec[2]),
        fw=jnp.asarray(fw),
        fb=jnp.asarray(fb),
        BA=jnp.asarray(BA, bf),
        A=jnp.asarray(A, bf),
        T_final=t,
        raw=dict(refine=raw["refine"], recon=raw["recon"],
                 B=jnp.asarray(B), A=jnp.asarray(A),
                 fw=jnp.asarray(fw), fb=float(fb[0])),
    )
    return model


# --------------------------------------------------------------------------
# Pure-JAX f32 reference (mirrors the PyTorch module semantics stage by stage)
# --------------------------------------------------------------------------
def srrn_forward_reference(x, model):
    raw = model["raw"]
    h = x.astype(jnp.float32)
    refs = []
    for i, st in enumerate(raw["refine"]):
        y = jnp.einsum("oc,nchw->nohw", st["w"], h)
        y = st["sc"][None, :, None, None] * y + st["sh"][None, :, None, None]
        y = jnp.maximum(y, 0.0)
        if i < 3:
            y = 0.5 * (y[..., 0::2] + y[..., 1::2])     # AvgPool2d((1, 2))
            refs.append(y)
        h = y
    rec = h
    for st in raw["recon"]:
        z = jnp.einsum("nchw,cowv->nohv", rec, st["m"])
        z = st["sc"][None, :, None, None] * z + st["sh"][None, :, None, None]
        rec = jnp.where(z > 0.0, z, jnp.expm1(z))
    up = jnp.einsum("nchw,wv->nchv", refs[-1], raw["B"])
    combined = up + rec
    conv = jnp.einsum("c,nchw->nhw", raw["fw"], combined) + raw["fb"]
    pooled_h = jnp.mean(conv, axis=1)                   # (N, W_rec)
    return pooled_h @ raw["A"]                          # (N, T_final)


if __name__ == "__main__":
    # Small shapes: batch=4, in_channels=4, H=8, W=T=64.
    N, C, H, T = 4, 4, 8, 64
    key = jax.random.PRNGKey(0)
    k_x, k_p = jax.random.split(key)
    x = jax.random.normal(k_x, (N, C, H, T), jnp.float32)

    model = build_model(C, T, T, k_p)

    out = jax.block_until_ready(srrn_forward_pallas(x, model))
    assert out.shape == (N, model["T_final"]), out.shape
    assert bool(jnp.all(jnp.isfinite(out)))

    ref = srrn_forward_reference(x, model)
    err = float(jnp.max(jnp.abs(out - ref)))
    scale = float(jnp.max(jnp.abs(ref)))
    # bf16 MXU operands across a ~9-stage dependent chain vs an unquantized
    # f32 reference: allow a few percent of the output scale.
    assert err <= 6e-2 * max(1.0, scale), (err, scale)

    print("KERNEL_OK")
</pallas_src>

<mosaic_0001>
module attributes {stable_mosaic.version = 11 : i64} {
  func.func @_srrn_kernel(%arg0: i32, %arg1: memref<4x16x64xbf16, #tpu.memory_space<vmem>>, %arg2: memref<64xf32, #tpu.memory_space<smem>>, %arg3: memref<16xf32, #tpu.memory_space<smem>>, %arg4: memref<64x32xbf16, #tpu.memory_space<vmem>>, %arg5: memref<32x16xbf16, #tpu.memory_space<vmem>>, %arg6: memref<16x8xbf16, #tpu.memory_space<vmem>>, %arg7: memref<4x8x64xbf16, #tpu.memory_space<vmem>>, %arg8: memref<1x64xf32, #tpu.memory_space<vmem>>, %arg9: memref<64x128xbf16, #tpu.memory_space<vmem>>, %arg10: memref<1x128xf32, #tpu.memory_space<vmem>>, %arg11: memref<4x128x64xbf16, #tpu.memory_space<vmem>>, %arg12: memref<4xf32, #tpu.memory_space<smem>>, %arg13: memref<4xf32, #tpu.memory_space<smem>>, %arg14: memref<1xf32, #tpu.memory_space<smem>>, %arg15: memref<8x64xbf16, #tpu.memory_space<vmem>>, %arg16: memref<64x64xbf16, #tpu.memory_space<vmem>>, %arg17: memref<1x2x64xf32, #tpu.memory_space<vmem>>) attributes {dimension_semantics = [#tpu.dimension_semantics<parallel>], iteration_bounds = array<i64: 2>, scalar_prefetch = 0 : i64, scratch_operands = 0 : i64, tpu.core_type = #tpu.core_type<tc>, window_params = [{transform_indices = @transform_0, window_bounds = array<i64: 4, 16, 64>}, {transform_indices = @transform_1, window_bounds = array<i64: 64>}, {transform_indices = @transform_2, window_bounds = array<i64: 16>}, {pipeline_mode = #tpu.pipeline_mode<synchronous>, transform_indices = @transform_3, window_bounds = array<i64: 64, 32>}, {pipeline_mode = #tpu.pipeline_mode<synchronous>, transform_indices = @transform_4, window_bounds = array<i64: 32, 16>}, {pipeline_mode = #tpu.pipeline_mode<synchronous>, transform_indices = @transform_5, window_bounds = array<i64: 16, 8>}, {pipeline_mode = #tpu.pipeline_mode<synchronous>, transform_indices = @transform_6, window_bounds = array<i64: 4, 8, 64>}, {pipeline_mode = #tpu.pipeline_mode<synchronous>, transform_indices = @transform_7, window_bounds = array<i64: 1, 64>}, {pipeline_mode = #tpu.pipeline_mode<synchronous>, transform_indices = @transform_8, window_bounds = array<i64: 64, 128>}, {pipeline_mode = #tpu.pipeline_mode<synchronous>, transform_indices = @transform_9, window_bounds = array<i64: 1, 128>}, {pipeline_mode = #tpu.pipeline_mode<synchronous>, transform_indices = @transform_10, window_bounds = array<i64: 4, 128, 64>}, {transform_indices = @transform_11, window_bounds = array<i64: 4>}, {transform_indices = @transform_12, window_bounds = array<i64: 4>}, {transform_indices = @transform_13, window_bounds = array<i64: 1>}, {pipeline_mode = #tpu.pipeline_mode<synchronous>, transform_indices = @transform_14, window_bounds = array<i64: 8, 64>}, {pipeline_mode = #tpu.pipeline_mode<synchronous>, transform_indices = @transform_15, window_bounds = array<i64: 64, 64>}, {transform_indices = @transform_16, window_bounds = array<i64: 1, 2, 64>}]} {
    %c0 = arith.constant 0 : index
    %c0_0 = arith.constant 0 : index
    %c0_1 = arith.constant 0 : index
    %0 = vector.load %arg1[%c0, %c0_0, %c0_1] : memref<4x16x64xbf16, #tpu.memory_space<vmem>>, vector<1x16x64xbf16>
    %1 = vector.shape_cast %0 : vector<1x16x64xbf16> to vector<16x64xbf16>
    %c1 = arith.constant 1 : index
    %c0_2 = arith.constant 0 : index
    %c0_3 = arith.constant 0 : index
    %2 = vector.load %arg1[%c1, %c0_2, %c0_3] : memref<4x16x64xbf16, #tpu.memory_space<vmem>>, vector<1x16x64xbf16>
    %3 = vector.shape_cast %2 : vector<1x16x64xbf16> to vector<16x64xbf16>
    %c2 = arith.constant 2 : index
    %c0_4 = arith.constant 0 : index
    %c0_5 = arith.constant 0 : index
    %4 = vector.load %arg1[%c2, %c0_4, %c0_5] : memref<4x16x64xbf16, #tpu.memory_space<vmem>>, vector<1x16x64xbf16>
    %5 = vector.shape_cast %4 : vector<1x16x64xbf16> to vector<16x64xbf16>
    %c3 = arith.constant 3 : index
    %c0_6 = arith.constant 0 : index
    %c0_7 = arith.constant 0 : index
    %6 = vector.load %arg1[%c3, %c0_6, %c0_7] : memref<4x16x64xbf16, #tpu.memory_space<vmem>>, vector<1x16x64xbf16>
    %7 = vector.shape_cast %6 : vector<1x16x64xbf16> to vector<16x64xbf16>
    %c0_8 = arith.constant 0 : index
    %8 = memref.load %arg2[%c0_8] : memref<64xf32, #tpu.memory_space<smem>>
    %9 = arith.extf %1 : vector<16x64xbf16> to vector<16x64xf32>
    %10 = vector.broadcast %8 : f32 to vector<16x64xf32>
    %11 = arith.mulf %10, %9 : vector<16x64xf32>
    %c1_9 = arith.constant 1 : index
    %12 = memref.load %arg2[%c1_9] : memref<64xf32, #tpu.memory_space<smem>>
    %13 = arith.extf %3 : vector<16x64xbf16> to vector<16x64xf32>
    %14 = vector.broadcast %12 : f32 to vector<16x64xf32>
    %15 = arith.mulf %14, %13 : vector<16x64xf32>
    %16 = arith.addf %11, %15 : vector<16x64xf32>
    %c2_10 = arith.constant 2 : index
    %17 = memref.load %arg2[%c2_10] : memref<64xf32, #tpu.memory_space<smem>>
    %18 = arith.extf %5 : vector<16x64xbf16> to vector<16x64xf32>
    %19 = vector.broadcast %17 : f32 to vector<16x64xf32>
    %20 = arith.mulf %19, %18 : vector<16x64xf32>
    %21 = arith.addf %16, %20 : vector<16x64xf32>
    %c3_11 = arith.constant 3 : index
    %22 = memref.load %arg2[%c3_11] : memref<64xf32, #tpu.memory_space<smem>>
    %23 = arith.extf %7 : vector<16x64xbf16> to vector<16x64xf32>
    %24 = vector.broadcast %22 : f32 to vector<16x64xf32>
    %25 = arith.mulf %24, %23 : vector<16x64xf32>
    %26 = arith.addf %21, %25 : vector<16x64xf32>
    %c0_12 = arith.constant 0 : index
    %27 = memref.load %arg3[%c0_12] : memref<16xf32, #tpu.memory_space<smem>>
    %28 = vector.broadcast %27 : f32 to vector<16x64xf32>
    %29 = arith.addf %26, %28 : vector<16x64xf32>
    %cst = arith.constant 0.000000e+00 : f32
    %30 = vector.broadcast %cst : f32 to vector<16x64xf32>
    %31 = arith.maximumf %29, %30 : vector<16x64xf32>
    %c4 = arith.constant 4 : index
    %32 = memref.load %arg2[%c4] : memref<64xf32, #tpu.memory_space<smem>>
    %33 = arith.extf %1 : vector<16x64xbf16> to vector<16x64xf32>
    %34 = vector.broadcast %32 : f32 to vector<16x64xf32>
    %35 = arith.mulf %34, %33 : vector<16x64xf32>
    %c5 = arith.constant 5 : index
    %36 = memref.load %arg2[%c5] : memref<64xf32, #tpu.memory_space<smem>>
    %37 = arith.extf %3 : vector<16x64xbf16> to vector<16x64xf32>
    %38 = vector.broadcast %36 : f32 to vector<16x64xf32>
    %39 = arith.mulf %38, %37 : vector<16x64xf32>
    %40 = arith.addf %35, %39 : vector<16x64xf32>
    %c6 = arith.constant 6 : index
    %41 = memref.load %arg2[%c6] : memref<64xf32, #tpu.memory_space<smem>>
    %42 = arith.extf %5 : vector<16x64xbf16> to vector<16x64xf32>
    %43 = vector.broadcast %41 : f32 to vector<16x64xf32>
    %44 = arith.mulf %43, %42 : vector<16x64xf32>
    %45 = arith.addf %40, %44 : vector<16x64xf32>
    %c7 = arith.constant 7 : index
    %46 = memref.load %arg2[%c7] : memref<64xf32, #tpu.memory_space<smem>>
    %47 = arith.extf %7 : vector<16x64xbf16> to vector<16x64xf32>
    %48 = vector.broadcast %46 : f32 to vector<16x64xf32>
    %49 = arith.mulf %48, %47 : vector<16x64xf32>
    %50 = arith.addf %45, %49 : vector<16x64xf32>
    %c1_13 = arith.constant 1 : index
    %51 = memref.load %arg3[%c1_13] : memref<16xf32, #tpu.memory_space<smem>>
    %52 = vector.broadcast %51 : f32 to vector<16x64xf32>
    %53 = arith.addf %50, %52 : vector<16x64xf32>
    %cst_14 = arith.constant 0.000000e+00 : f32
    %54 = vector.broadcast %cst_14 : f32 to vector<16x64xf32>
    %55 = arith.maximumf %53, %54 : vector<16x64xf32>
    %c8 = arith.constant 8 : index
    %56 = memref.load %arg2[%c8] : memref<64xf32, #tpu.memory_space<smem>>
    %57 = arith.extf %1 : vector<16x64xbf16> to vector<16x64xf32>
    %58 = vector.broadcast %56 : f32 to vector<16x64xf32>
    %59 = arith.mulf %58, %57 : vector<16x64xf32>
    %c9 = arith.constant 9 : index
    %60 = memref.load %arg2[%c9] : memref<64xf32, #tpu.memory_space<smem>>
    %61 = arith.extf %3 : vector<16x64xbf16> to vector<16x64xf32>
    %62 = vector.broadcast %60 : f32 to vector<16x64xf32>
    %63 = arith.mulf %62, %61 : vector<16x64xf32>
    %64 = arith.addf %59, %63 : vector<16x64xf32>
    %c10 = arith.constant 10 : index
    %65 = memref.load %arg2[%c10] : memref<64xf32, #tpu.memory_space<smem>>
    %66 = arith.extf %5 : vector<16x64xbf16> to vector<16x64xf32>
    %67 = vector.broadcast %65 : f32 to vector<16x64xf32>
    %68 = arith.mulf %67, %66 : vector<16x64xf32>
    %69 = arith.addf %64, %68 : vector<16x64xf32>
    %c11 = arith.constant 11 : index
    %70 = memref.load %arg2[%c11] : memref<64xf32, #tpu.memory_space<smem>>
    %71 = arith.extf %7 : vector<16x64xbf16> to vector<16x64xf32>
    %72 = vector.broadcast %70 : f32 to vector<16x64xf32>
    %73 = arith.mulf %72, %71 : vector<16x64xf32>
    %74 = arith.addf %69, %73 : vector<16x64xf32>
    %c2_15 = arith.constant 2 : index
    %75 = memref.load %arg3[%c2_15] : memref<16xf32, #tpu.memory_space<smem>>
    %76 = vector.broadcast %75 : f32 to vector<16x64xf32>
    %77 = arith.addf %74, %76 : vector<16x64xf32>
    %cst_16 = arith.constant 0.000000e+00 : f32
    %78 = vector.broadcast %cst_16 : f32 to vector<16x64xf32>
    %79 = arith.maximumf %77, %78 : vector<16x64xf32>
    %c12 = arith.constant 12 : index
    %80 = memref.load %arg2[%c12] : memref<64xf32, #tpu.memory_space<smem>>
    %81 = arith.extf %1 : vector<16x64xbf16> to vector<16x64xf32>
    %82 = vector.broadcast %80 : f32 to vector<16x64xf32>
    %83 = arith.mulf %82, %81 : vector<16x64xf32>
    %c13 = arith.constant 13 : index
    %84 = memref.load %arg2[%c13] : memref<64xf32, #tpu.memory_space<smem>>
    %85 = arith.extf %3 : vector<16x64xbf16> to vector<16x64xf32>
    %86 = vector.broadcast %84 : f32 to vector<16x64xf32>
    %87 = arith.mulf %86, %85 : vector<16x64xf32>
    %88 = arith.addf %83, %87 : vector<16x64xf32>
    %c14 = arith.constant 14 : index
    %89 = memref.load %arg2[%c14] : memref<64xf32, #tpu.memory_space<smem>>
    %90 = arith.extf %5 : vector<16x64xbf16> to vector<16x64xf32>
    %91 = vector.broadcast %89 : f32 to vector<16x64xf32>
    %92 = arith.mulf %91, %90 : vector<16x64xf32>
    %93 = arith.addf %88, %92 : vector<16x64xf32>
    %c15 = arith.constant 15 : index
    %94 = memref.load %arg2[%c15] : memref<64xf32, #tpu.memory_space<smem>>
    %95 = arith.extf %7 : vector<16x64xbf16> to vector<16x64xf32>
    %96 = vector.broadcast %94 : f32 to vector<16x64xf32>
    %97 = arith.mulf %96, %95 : vector<16x64xf32>
    %98 = arith.addf %93, %97 : vector<16x64xf32>
    %c3_17 = arith.constant 3 : index
    %99 = memref.load %arg3[%c3_17] : memref<16xf32, #tpu.memory_space<smem>>
    %100 = vector.broadcast %99 : f32 to vector<16x64xf32>
    %101 = arith.addf %98, %100 : vector<16x64xf32>
    %cst_18 = arith.constant 0.000000e+00 : f32
    %102 = vector.broadcast %cst_18 : f32 to vector<16x64xf32>
    %103 = arith.maximumf %101, %102 : vector<16x64xf32>
    %c0_19 = arith.constant 0 : index
    %c0_20 = arith.constant 0 : index
    %104 = vector.load %arg4[%c0_19, %c0_20] : memref<64x32xbf16, #tpu.memory_space<vmem>>, vector<64x32xbf16>
    %105 = arith.truncf %31 : vector<16x64xf32> to vector<16x64xbf16>
    %cst_21 = arith.constant dense<0.000000e+00> : vector<16x32xf32>
    %106 = tpu.matmul %105, %104, %cst_21 {dimension_numbers = #tpu.dot_dimension_numbers<[1], [0], [0], [1], [0, 0, 1, 1], [], []>} : vector<16x64xbf16>, vector<64x32xbf16>, vector<16x32xf32> -> vector<16x32xf32>
    %107 = arith.truncf %55 : vector<16x64xf32> to vector<16x64xbf16>
    %cst_22 = arith.constant dense<0.000000e+00> : vector<16x32xf32>
    %108 = tpu.matmul %107, %104, %cst_22 {dimension_numbers = #tpu.dot_dimension_numbers<[1], [0], [0], [1], [0, 0, 1, 1], [], []>} : vector<16x64xbf16>, vector<64x32xbf16>, vector<16x32xf32> -> vector<16x32xf32>
    %109 = arith.truncf %79 : vector<16x64xf32> to vector<16x64xbf16>
    %cst_23 = arith.constant dense<0.000000e+00> : vector<16x32xf32>
    %110 = tpu.matmul %109, %104, %cst_23 {dimension_numbers = #tpu.dot_dimension_numbers<[1], [0], [0], [1], [0, 0, 1, 1], [], []>} : vector<16x64xbf16>, vector<64x32xbf16>, vector<16x32xf32> -> vector<16x32xf32>
    %111 = arith.truncf %103 : vector<16x64xf32> to vector<16x64xbf16>
    %cst_24 = arith.constant dense<0.000000e+00> : vector<16x32xf32>
    %112 = tpu.matmul %111, %104, %cst_24 {dimension_numbers = #tpu.dot_dimension_numbers<[1], [0], [0], [1], [0, 0, 1, 1], [], []>} : vector<16x64xbf16>, vector<64x32xbf16>, vector<16x32xf32> -> vector<16x32xf32>
    %c16 = arith.constant 16 : index
    %113 = memref.load %arg2[%c16] : memref<64xf32, #tpu.memory_space<smem>>
    %114 = vector.broadcast %113 : f32 to vector<16x32xf32>
    %115 = arith.mulf %114, %106 : vector<16x32xf32>
    %c17 = arith.constant 17 : index
    %116 = memref.load %arg2[%c17] : memref<64xf32, #tpu.memory_space<smem>>
    %117 = vector.broadcast %116 : f32 to vector<16x32xf32>
    %118 = arith.mulf %117, %108 : vector<16x32xf32>
    %119 = arith.addf %115, %118 : vector<16x32xf32>
    %c18 = arith.constant 18 : index
    %120 = memref.load %arg2[%c18] : memref<64xf32, #tpu.memory_space<smem>>
    %121 = vector.broadcast %120 : f32 to vector<16x32xf32>
    %122 = arith.mulf %121, %110 : vector<16x32xf32>
    %123 = arith.addf %119, %122 : vector<16x32xf32>
    %c19 = arith.constant 19 : index
    %124 = memref.load %arg2[%c19] : memref<64xf32, #tpu.memory_space<smem>>
    %125 = vector.broadcast %124 : f32 to vector<16x32xf32>
    %126 = arith.mulf %125, %112 : vector<16x32xf32>
    %127 = arith.addf %123, %126 : vector<16x32xf32>
    %c4_25 = arith.constant 4 : index
    %128 = memref.load %arg3[%c4_25] : memref<16xf32, #tpu.memory_space<smem>>
    %129 = vector.broadcast %128 : f32 to vector<16x32xf32>
    %130 = arith.addf %127, %129 : vector<16x32xf32>
    %cst_26 = arith.constant 0.000000e+00 : f32
    %131 = vector.broadcast %cst_26 : f32 to vector<16x32xf32>
    %132 = arith.maximumf %130, %131 : vector<16x32xf32>
    %c20 = arith.constant 20 : index
    %133 = memref.load %arg2[%c20] : memref<64xf32, #tpu.memory_space<smem>>
    %134 = vector.broadcast %133 : f32 to vector<16x32xf32>
    %135 = arith.mulf %134, %106 : vector<16x32xf32>
    %c21 = arith.constant 21 : index
    %136 = memref.load %arg2[%c21] : memref<64xf32, #tpu.memory_space<smem>>
    %137 = vector.broadcast %136 : f32 to vector<16x32xf32>
    %138 = arith.mulf %137, %108 : vector<16x32xf32>
    %139 = arith.addf %135, %138 : vector<16x32xf32>
    %c22 = arith.constant 22 : index
    %140 = memref.load %arg2[%c22] : memref<64xf32, #tpu.memory_space<smem>>
    %141 = vector.broadcast %140 : f32 to vector<16x32xf32>
    %142 = arith.mulf %141, %110 : vector<16x32xf32>
    %143 = arith.addf %139, %142 : vector<16x32xf32>
    %c23 = arith.constant 23 : index
    %144 = memref.load %arg2[%c23] : memref<64xf32, #tpu.memory_space<smem>>
    %145 = vector.broadcast %144 : f32 to vector<16x32xf32>
    %146 = arith.mulf %145, %112 : vector<16x32xf32>
    %147 = arith.addf %143, %146 : vector<16x32xf32>
    %c5_27 = arith.constant 5 : index
    %148 = memref.load %arg3[%c5_27] : memref<16xf32, #tpu.memory_space<smem>>
    %149 = vector.broadcast %148 : f32 to vector<16x32xf32>
    %150 = arith.addf %147, %149 : vector<16x32xf32>
    %cst_28 = arith.constant 0.000000e+00 : f32
    %151 = vector.broadcast %cst_28 : f32 to vector<16x32xf32>
    %152 = arith.maximumf %150, %151 : vector<16x32xf32>
    %c24 = arith.constant 24 : index
    %153 = memref.load %arg2[%c24] : memref<64xf32, #tpu.memory_space<smem>>
    %154 = vector.broadcast %153 : f32 to vector<16x32xf32>
    %155 = arith.mulf %154, %106 : vector<16x32xf32>
    %c25 = arith.constant 25 : index
    %156 = memref.load %arg2[%c25] : memref<64xf32, #tpu.memory_space<smem>>
    %157 = vector.broadcast %156 : f32 to vector<16x32xf32>
    %158 = arith.mulf %157, %108 : vector<16x32xf32>
    %159 = arith.addf %155, %158 : vector<16x32xf32>
    %c26 = arith.constant 26 : index
    %160 = memref.load %arg2[%c26] : memref<64xf32, #tpu.memory_space<smem>>
    %161 = vector.broadcast %160 : f32 to vector<16x32xf32>
    %162 = arith.mulf %161, %110 : vector<16x32xf32>
    %163 = arith.addf %159, %162 : vector<16x32xf32>
    %c27 = arith.constant 27 : index
    %164 = memref.load %arg2[%c27] : memref<64xf32, #tpu.memory_space<smem>>
    %165 = vector.broadcast %164 : f32 to vector<16x32xf32>
    %166 = arith.mulf %165, %112 : vector<16x32xf32>
    %167 = arith.addf %163, %166 : vector<16x32xf32>
    %c6_29 = arith.constant 6 : index
    %168 = memref.load %arg3[%c6_29] : memref<16xf32, #tpu.memory_space<smem>>
    %169 = vector.broadcast %168 : f32 to vector<16x32xf32>
    %170 = arith.addf %167, %169 : vector<16x32xf32>
    %cst_30 = arith.constant 0.000000e+00 : f32
    %171 = vector.broadcast %cst_30 : f32 to vector<16x32xf32>
    %172 = arith.maximumf %170, %171 : vector<16x32xf32>
    %c28 = arith.constant 28 : index
    %173 = memref.load %arg2[%c28] : memref<64xf32, #tpu.memory_space<smem>>
    %174 = vector.broadcast %173 : f32 to vector<16x32xf32>
    %175 = arith.mulf %174, %106 : vector<16x32xf32>
    %c29 = arith.constant 29 : index
    %176 = memref.load %arg2[%c29] : memref<64xf32, #tpu.memory_space<smem>>
    %177 = vector.broadcast %176 : f32 to vector<16x32xf32>
    %178 = arith.mulf %177, %108 : vector<16x32xf32>
    %179 = arith.addf %175, %178 : vector<16x32xf32>
    %c30 = arith.constant 30 : index
    %180 = memref.load %arg2[%c30] : memref<64xf32, #tpu.memory_space<smem>>
    %181 = vector.broadcast %180 : f32 to vector<16x32xf32>
    %182 = arith.mulf %181, %110 : vector<16x32xf32>
    %183 = arith.addf %179, %182 : vector<16x32xf32>
    %c31 = arith.constant 31 : index
    %184 = memref.load %arg2[%c31] : memref<64xf32, #tpu.memory_space<smem>>
    %185 = vector.broadcast %184 : f32 to vector<16x32xf32>
    %186 = arith.mulf %185, %112 : vector<16x32xf32>
    %187 = arith.addf %183, %186 : vector<16x32xf32>
    %c7_31 = arith.constant 7 : index
    %188 = memref.load %arg3[%c7_31] : memref<16xf32, #tpu.memory_space<smem>>
    %189 = vector.broadcast %188 : f32 to vector<16x32xf32>
    %190 = arith.addf %187, %189 : vector<16x32xf32>
    %cst_32 = arith.constant 0.000000e+00 : f32
    %191 = vector.broadcast %cst_32 : f32 to vector<16x32xf32>
    %192 = arith.maximumf %190, %191 : vector<16x32xf32>
    %c0_33 = arith.constant 0 : index
    %c0_34 = arith.constant 0 : index
    %193 = vector.load %arg5[%c0_33, %c0_34] : memref<32x16xbf16, #tpu.memory_space<vmem>>, vector<32x16xbf16>
    %194 = arith.truncf %132 : vector<16x32xf32> to vector<16x32xbf16>
    %cst_35 = arith.constant dense<0.000000e+00> : vector<16x16xf32>
    %195 = tpu.matmul %194, %193, %cst_35 {dimension_numbers = #tpu.dot_dimension_numbers<[1], [0], [0], [1], [0, 0, 1, 1], [], []>} : vector<16x32xbf16>, vector<32x16xbf16>, vector<16x16xf32> -> vector<16x16xf32>
    %196 = arith.truncf %152 : vector<16x32xf32> to vector<16x32xbf16>
    %cst_36 = arith.constant dense<0.000000e+00> : vector<16x16xf32>
    %197 = tpu.matmul %196, %193, %cst_36 {dimension_numbers = #tpu.dot_dimension_numbers<[1], [0], [0], [1], [0, 0, 1, 1], [], []>} : vector<16x32xbf16>, vector<32x16xbf16>, vector<16x16xf32> -> vector<16x16xf32>
    %198 = arith.truncf %172 : vector<16x32xf32> to vector<16x32xbf16>
    %cst_37 = arith.constant dense<0.000000e+00> : vector<16x16xf32>
    %199 = tpu.matmul %198, %193, %cst_37 {dimension_numbers = #tpu.dot_dimension_numbers<[1], [0], [0], [1], [0, 0, 1, 1], [], []>} : vector<16x32xbf16>, vector<32x16xbf16>, vector<16x16xf32> -> vector<16x16xf32>
    %200 = arith.truncf %192 : vector<16x32xf32> to vector<16x32xbf16>
    %cst_38 = arith.constant dense<0.000000e+00> : vector<16x16xf32>
    %201 = tpu.matmul %200, %193, %cst_38 {dimension_numbers = #tpu.dot_dimension_numbers<[1], [0], [0], [1], [0, 0, 1, 1], [], []>} : vector<16x32xbf16>, vector<32x16xbf16>, vector<16x16xf32> -> vector<16x16xf32>
    %c32 = arith.constant 32 : index
    %202 = memref.load %arg2[%c32] : memref<64xf32, #tpu.memory_space<smem>>
    %203 = vector.broadcast %202 : f32 to vector<16x16xf32>
    %204 = arith.mulf %203, %195 : vector<16x16xf32>
    %c33 = arith.constant 33 : index
    %205 = memref.load %arg2[%c33] : memref<64xf32, #tpu.memory_space<smem>>
    %206 = vector.broadcast %205 : f32 to vector<16x16xf32>
    %207 = arith.mulf %206, %197 : vector<16x16xf32>
    %208 = arith.addf %204, %207 : vector<16x16xf32>
    %c34 = arith.constant 34 : index
    %209 = memref.load %arg2[%c34] : memref<64xf32, #tpu.memory_space<smem>>
    %210 = vector.broadcast %209 : f32 to vector<16x16xf32>
    %211 = arith.mulf %210, %199 : vector<16x16xf32>
    %212 = arith.addf %208, %211 : vector<16x16xf32>
    %c35 = arith.constant 35 : index
    %213 = memref.load %arg2[%c35] : memref<64xf32, #tpu.memory_space<smem>>
    %214 = vector.broadcast %213 : f32 to vector<16x16xf32>
    %215 = arith.mulf %214, %201 : vector<16x16xf32>
    %216 = arith.addf %212, %215 : vector<16x16xf32>
    %c8_39 = arith.constant 8 : index
    %217 = memref.load %arg3[%c8_39] : memref<16xf32, #tpu.memory_space<smem>>
    %218 = vector.broadcast %217 : f32 to vector<16x16xf32>
    %219 = arith.addf %216, %218 : vector<16x16xf32>
    %cst_40 = arith.constant 0.000000e+00 : f32
    %220 = vector.broadcast %cst_40 : f32 to vector<16x16xf32>
    %221 = arith.maximumf %219, %220 : vector<16x16xf32>
    %c36 = arith.constant 36 : index
    %222 = memref.load %arg2[%c36] : memref<64xf32, #tpu.memory_space<smem>>
    %223 = vector.broadcast %222 : f32 to vector<16x16xf32>
    %224 = arith.mulf %223, %195 : vector<16x16xf32>
    %c37 = arith.constant 37 : index
    %225 = memref.load %arg2[%c37] : memref<64xf32, #tpu.memory_space<smem>>
    %226 = vector.broadcast %225 : f32 to vector<16x16xf32>
    %227 = arith.mulf %226, %197 : vector<16x16xf32>
    %228 = arith.addf %224, %227 : vector<16x16xf32>
    %c38 = arith.constant 38 : index
    %229 = memref.load %arg2[%c38] : memref<64xf32, #tpu.memory_space<smem>>
    %230 = vector.broadcast %229 : f32 to vector<16x16xf32>
    %231 = arith.mulf %230, %199 : vector<16x16xf32>
    %232 = arith.addf %228, %231 : vector<16x16xf32>
    %c39 = arith.constant 39 : index
    %233 = memref.load %arg2[%c39] : memref<64xf32, #tpu.memory_space<smem>>
    %234 = vector.broadcast %233 : f32 to vector<16x16xf32>
    %235 = arith.mulf %234, %201 : vector<16x16xf32>
    %236 = arith.addf %232, %235 : vector<16x16xf32>
    %c9_41 = arith.constant 9 : index
    %237 = memref.load %arg3[%c9_41] : memref<16xf32, #tpu.memory_space<smem>>
    %238 = vector.broadcast %237 : f32 to vector<16x16xf32>
    %239 = arith.addf %236, %238 : vector<16x16xf32>
    %cst_42 = arith.constant 0.000000e+00 : f32
    %240 = vector.broadcast %cst_42 : f32 to vector<16x16xf32>
    %241 = arith.maximumf %239, %240 : vector<16x16xf32>
    %c40 = arith.constant 40 : index
    %242 = memref.load %arg2[%c40] : memref<64xf32, #tpu.memory_space<smem>>
    %243 = vector.broadcast %242 : f32 to vector<16x16xf32>
    %244 = arith.mulf %243, %195 : vector<16x16xf32>
    %c41 = arith.constant 41 : index
    %245 = memref.load %arg2[%c41] : memref<64xf32, #tpu.memory_space<smem>>
    %246 = vector.broadcast %245 : f32 to vector<16x16xf32>
    %247 = arith.mulf %246, %197 : vector<16x16xf32>
    %248 = arith.addf %244, %247 : vector<16x16xf32>
    %c42 = arith.constant 42 : index
    %249 = memref.load %arg2[%c42] : memref<64xf32, #tpu.memory_space<smem>>
    %250 = vector.broadcast %249 : f32 to vector<16x16xf32>
    %251 = arith.mulf %250, %199 : vector<16x16xf32>
    %252 = arith.addf %248, %251 : vector<16x16xf32>
    %c43 = arith.constant 43 : index
    %253 = memref.load %arg2[%c43] : memref<64xf32, #tpu.memory_space<smem>>
    %254 = vector.broadcast %253 : f32 to vector<16x16xf32>
    %255 = arith.mulf %254, %201 : vector<16x16xf32>
    %256 = arith.addf %252, %255 : vector<16x16xf32>
    %c10_43 = arith.constant 10 : index
    %257 = memref.load %arg3[%c10_43] : memref<16xf32, #tpu.memory_space<smem>>
    %258 = vector.broadcast %257 : f32 to vector<16x16xf32>
    %259 = arith.addf %256, %258 : vector<16x16xf32>
    %cst_44 = arith.constant 0.000000e+00 : f32
    %260 = vector.broadcast %cst_44 : f32 to vector<16x16xf32>
    %261 = arith.maximumf %259, %260 : vector<16x16xf32>
    %c44 = arith.constant 44 : index
    %262 = memref.load %arg2[%c44] : memref<64xf32, #tpu.memory_space<smem>>
    %263 = vector.broadcast %262 : f32 to vector<16x16xf32>
    %264 = arith.mulf %263, %195 : vector<16x16xf32>
    %c45 = arith.constant 45 : index
    %265 = memref.load %arg2[%c45] : memref<64xf32, #tpu.memory_space<smem>>
    %266 = vector.broadcast %265 : f32 to vector<16x16xf32>
    %267 = arith.mulf %266, %197 : vector<16x16xf32>
    %268 = arith.addf %264, %267 : vector<16x16xf32>
    %c46 = arith.constant 46 : index
    %269 = memref.load %arg2[%c46] : memref<64xf32, #tpu.memory_space<smem>>
    %270 = vector.broadcast %269 : f32 to vector<16x16xf32>
    %271 = arith.mulf %270, %199 : vector<16x16xf32>
    %272 = arith.addf %268, %271 : vector<16x16xf32>
    %c47 = arith.constant 47 : index
    %273 = memref.load %arg2[%c47] : memref<64xf32, #tpu.memory_space<smem>>
    %274 = vector.broadcast %273 : f32 to vector<16x16xf32>
    %275 = arith.mulf %274, %201 : vector<16x16xf32>
    %276 = arith.addf %272, %275 : vector<16x16xf32>
    %c11_45 = arith.constant 11 : index
    %277 = memref.load %arg3[%c11_45] : memref<16xf32, #tpu.memory_space<smem>>
    %278 = vector.broadcast %277 : f32 to vector<16x16xf32>
    %279 = arith.addf %276, %278 : vector<16x16xf32>
    %cst_46 = arith.constant 0.000000e+00 : f32
    %280 = vector.broadcast %cst_46 : f32 to vector<16x16xf32>
    %281 = arith.maximumf %279, %280 : vector<16x16xf32>
    %c0_47 = arith.constant 0 : index
    %c0_48 = arith.constant 0 : index
    %282 = vector.load %arg6[%c0_47, %c0_48] : memref<16x8xbf16, #tpu.memory_space<vmem>>, vector<16x8xbf16>
    %283 = arith.truncf %221 : vector<16x16xf32> to vector<16x16xbf16>
    %cst_49 = arith.constant dense<0.000000e+00> : vector<16x8xf32>
    %284 = tpu.matmul %283, %282, %cst_49 {dimension_numbers = #tpu.dot_dimension_numbers<[1], [0], [0], [1], [0, 0, 1, 1], [], []>} : vector<16x16xbf16>, vector<16x8xbf16>, vector<16x8xf32> -> vector<16x8xf32>
    %285 = arith.truncf %241 : vector<16x16xf32> to vector<16x16xbf16>
    %cst_50 = arith.constant dense<0.000000e+00> : vector<16x8xf32>
    %286 = tpu.matmul %285, %282, %cst_50 {dimension_numbers = #tpu.dot_dimension_numbers<[1], [0], [0], [1], [0, 0, 1, 1], [], []>} : vector<16x16xbf16>, vector<16x8xbf16>, vector<16x8xf32> -> vector<16x8xf32>
    %287 = arith.truncf %261 : vector<16x16xf32> to vector<16x16xbf16>
    %cst_51 = arith.constant dense<0.000000e+00> : vector<16x8xf32>
    %288 = tpu.matmul %287, %282, %cst_51 {dimension_numbers = #tpu.dot_dimension_numbers<[1], [0], [0], [1], [0, 0, 1, 1], [], []>} : vector<16x16xbf16>, vector<16x8xbf16>, vector<16x8xf32> -> vector<16x8xf32>
    %289 = arith.truncf %281 : vector<16x16xf32> to vector<16x16xbf16>
    %cst_52 = arith.constant dense<0.000000e+00> : vector<16x8xf32>
    %290 = tpu.matmul %289, %282, %cst_52 {dimension_numbers = #tpu.dot_dimension_numbers<[1], [0], [0], [1], [0, 0, 1, 1], [], []>} : vector<16x16xbf16>, vector<16x8xbf16>, vector<16x8xf32> -> vector<16x8xf32>
    %c48 = arith.constant 48 : index
    %291 = memref.load %arg2[%c48] : memref<64xf32, #tpu.memory_space<smem>>
    %292 = vector.broadcast %291 : f32 to vector<16x8xf32>
    %293 = arith.mulf %292, %284 : vector<16x8xf32>
    %c49 = arith.constant 49 : index
    %294 = memref.load %arg2[%c49] : memref<64xf32, #tpu.memory_space<smem>>
    %295 = vector.broadcast %294 : f32 to vector<16x8xf32>
    %296 = arith.mulf %295, %286 : vector<16x8xf32>
    %297 = arith.addf %293, %296 : vector<16x8xf32>
    %c50 = arith.constant 50 : index
    %298 = memref.load %arg2[%c50] : memref<64xf32, #tpu.memory_space<smem>>
    %299 = vector.broadcast %298 : f32 to vector<16x8xf32>
    %300 = arith.mulf %299, %288 : vector<16x8xf32>
    %301 = arith.addf %297, %300 : vector<16x8xf32>
    %c51 = arith.constant 51 : index
    %302 = memref.load %arg2[%c51] : memref<64xf32, #tpu.memory_space<smem>>
    %303 = vector.broadcast %302 : f32 to vector<16x8xf32>
    %304 = arith.mulf %303, %290 : vector<16x8xf32>
    %305 = arith.addf %301, %304 : vector<16x8xf32>
    %c12_53 = arith.constant 12 : index
    %306 = memref.load %arg3[%c12_53] : memref<16xf32, #tpu.memory_space<smem>>
    %307 = vector.broadcast %306 : f32 to vector<16x8xf32>
    %308 = arith.addf %305, %307 : vector<16x8xf32>
    %cst_54 = arith.constant 0.000000e+00 : f32
    %309 = vector.broadcast %cst_54 : f32 to vector<16x8xf32>
    %310 = arith.maximumf %308, %309 : vector<16x8xf32>
    %c52 = arith.constant 52 : index
    %311 = memref.load %arg2[%c52] : memref<64xf32, #tpu.memory_space<smem>>
    %312 = vector.broadcast %311 : f32 to vector<16x8xf32>
    %313 = arith.mulf %312, %284 : vector<16x8xf32>
    %c53 = arith.constant 53 : index
    %314 = memref.load %arg2[%c53] : memref<64xf32, #tpu.memory_space<smem>>
    %315 = vector.broadcast %314 : f32 to vector<16x8xf32>
    %316 = arith.mulf %315, %286 : vector<16x8xf32>
    %317 = arith.addf %313, %316 : vector<16x8xf32>
    %c54 = arith.constant 54 : index
    %318 = memref.load %arg2[%c54] : memref<64xf32, #tpu.memory_space<smem>>
    %319 = vector.broadcast %318 : f32 to vector<16x8xf32>
    %320 = arith.mulf %319, %288 : vector<16x8xf32>
    %321 = arith.addf %317, %320 : vector<16x8xf32>
    %c55 = arith.constant 55 : index
    %322 = memref.load %arg2[%c55] : memref<64xf32, #tpu.memory_space<smem>>
    %323 = vector.broadcast %322 : f32 to vector<16x8xf32>
    %324 = arith.mulf %323, %290 : vector<16x8xf32>
    %325 = arith.addf %321, %324 : vector<16x8xf32>
    %c13_55 = arith.constant 13 : index
    %326 = memref.load %arg3[%c13_55] : memref<16xf32, #tpu.memory_space<smem>>
    %327 = vector.broadcast %326 : f32 to vector<16x8xf32>
    %328 = arith.addf %325, %327 : vector<16x8xf32>
    %cst_56 = arith.constant 0.000000e+00 : f32
    %329 = vector.broadcast %cst_56 : f32 to vector<16x8xf32>
    %330 = arith.maximumf %328, %329 : vector<16x8xf32>
    %c56 = arith.constant 56 : index
    %331 = memref.load %arg2[%c56] : memref<64xf32, #tpu.memory_space<smem>>
    %332 = vector.broadcast %331 : f32 to vector<16x8xf32>
    %333 = arith.mulf %332, %284 : vector<16x8xf32>
    %c57 = arith.constant 57 : index
    %334 = memref.load %arg2[%c57] : memref<64xf32, #tpu.memory_space<smem>>
    %335 = vector.broadcast %334 : f32 to vector<16x8xf32>
    %336 = arith.mulf %335, %286 : vector<16x8xf32>
    %337 = arith.addf %333, %336 : vector<16x8xf32>
    %c58 = arith.constant 58 : index
    %338 = memref.load %arg2[%c58] : memref<64xf32, #tpu.memory_space<smem>>
    %339 = vector.broadcast %338 : f32 to vector<16x8xf32>
    %340 = arith.mulf %339, %288 : vector<16x8xf32>
    %341 = arith.addf %337, %340 : vector<16x8xf32>
    %c59 = arith.constant 59 : index
    %342 = memref.load %arg2[%c59] : memref<64xf32, #tpu.memory_space<smem>>
    %343 = vector.broadcast %342 : f32 to vector<16x8xf32>
    %344 = arith.mulf %343, %290 : vector<16x8xf32>
    %345 = arith.addf %341, %344 : vector<16x8xf32>
    %c14_57 = arith.constant 14 : index
    %346 = memref.load %arg3[%c14_57] : memref<16xf32, #tpu.memory_space<smem>>
    %347 = vector.broadcast %346 : f32 to vector<16x8xf32>
    %348 = arith.addf %345, %347 : vector<16x8xf32>
    %cst_58 = arith.constant 0.000000e+00 : f32
    %349 = vector.broadcast %cst_58 : f32 to vector<16x8xf32>
    %350 = arith.maximumf %348, %349 : vector<16x8xf32>
    %c60 = arith.constant 60 : index
    %351 = memref.load %arg2[%c60] : memref<64xf32, #tpu.memory_space<smem>>
    %352 = vector.broadcast %351 : f32 to vector<16x8xf32>
    %353 = arith.mulf %352, %284 : vector<16x8xf32>
    %c61 = arith.constant 61 : index
    %354 = memref.load %arg2[%c61] : memref<64xf32, #tpu.memory_space<smem>>
    %355 = vector.broadcast %354 : f32 to vector<16x8xf32>
    %356 = arith.mulf %355, %286 : vector<16x8xf32>
    %357 = arith.addf %353, %356 : vector<16x8xf32>
    %c62 = arith.constant 62 : index
    %358 = memref.load %arg2[%c62] : memref<64xf32, #tpu.memory_space<smem>>
    %359 = vector.broadcast %358 : f32 to vector<16x8xf32>
    %360 = arith.mulf %359, %288 : vector<16x8xf32>
    %361 = arith.addf %357, %360 : vector<16x8xf32>
    %c63 = arith.constant 63 : index
    %362 = memref.load %arg2[%c63] : memref<64xf32, #tpu.memory_space<smem>>
    %363 = vector.broadcast %362 : f32 to vector<16x8xf32>
    %364 = arith.mulf %363, %290 : vector<16x8xf32>
    %365 = arith.addf %361, %364 : vector<16x8xf32>
    %c15_59 = arith.constant 15 : index
    %366 = memref.load %arg3[%c15_59] : memref<16xf32, #tpu.memory_space<smem>>
    %367 = vector.broadcast %366 : f32 to vector<16x8xf32>
    %368 = arith.addf %365, %367 : vector<16x8xf32>
    %cst_60 = arith.constant 0.000000e+00 : f32
    %369 = vector.broadcast %cst_60 : f32 to vector<16x8xf32>
    %370 = arith.maximumf %368, %369 : vector<16x8xf32>
    %371 = arith.truncf %310 : vector<16x8xf32> to vector<16x8xbf16>
    %c0_61 = arith.constant 0 : index
    %c0_62 = arith.constant 0 : index
    %c0_63 = arith.constant 0 : index
    %372 = vector.load %arg7[%c0_61, %c0_62, %c0_63] : memref<4x8x64xbf16, #tpu.memory_space<vmem>>, vector<1x8x64xbf16>
    %373 = vector.shape_cast %372 : vector<1x8x64xbf16> to vector<8x64xbf16>
    %cst_64 = arith.constant dense<0.000000e+00> : vector<16x64xf32>
    %374 = tpu.matmul %371, %373, %cst_64 {dimension_numbers = #tpu.dot_dimension_numbers<[1], [0], [0], [1], [0, 0, 1, 1], [], []>} : vector<16x8xbf16>, vector<8x64xbf16>, vector<16x64xf32> -> vector<16x64xf32>
    %375 = arith.truncf %330 : vector<16x8xf32> to vector<16x8xbf16>
    %c1_65 = arith.constant 1 : index
    %c0_66 = arith.constant 0 : index
    %c0_67 = arith.constant 0 : index
    %376 = vector.load %arg7[%c1_65, %c0_66, %c0_67] : memref<4x8x64xbf16, #tpu.memory_space<vmem>>, vector<1x8x64xbf16>
    %377 = vector.shape_cast %376 : vector<1x8x64xbf16> to vector<8x64xbf16>
    %cst_68 = arith.constant dense<0.000000e+00> : vector<16x64xf32>
    %378 = tpu.matmul %375, %377, %cst_68 {dimension_numbers = #tpu.dot_dimension_numbers<[1], [0], [0], [1], [0, 0, 1, 1], [], []>} : vector<16x8xbf16>, vector<8x64xbf16>, vector<16x64xf32> -> vector<16x64xf32>
    %379 = arith.addf %374, %378 : vector<16x64xf32>
    %380 = arith.truncf %350 : vector<16x8xf32> to vector<16x8xbf16>
    %c2_69 = arith.constant 2 : index
    %c0_70 = arith.constant 0 : index
    %c0_71 = arith.constant 0 : index
    %381 = vector.load %arg7[%c2_69, %c0_70, %c0_71] : memref<4x8x64xbf16, #tpu.memory_space<vmem>>, vector<1x8x64xbf16>
    %382 = vector.shape_cast %381 : vector<1x8x64xbf16> to vector<8x64xbf16>
    %cst_72 = arith.constant dense<0.000000e+00> : vector<16x64xf32>
    %383 = tpu.matmul %380, %382, %cst_72 {dimension_numbers = #tpu.dot_dimension_numbers<[1], [0], [0], [1], [0, 0, 1, 1], [], []>} : vector<16x8xbf16>, vector<8x64xbf16>, vector<16x64xf32> -> vector<16x64xf32>
    %384 = arith.addf %379, %383 : vector<16x64xf32>
    %385 = arith.truncf %370 : vector<16x8xf32> to vector<16x8xbf16>
    %c3_73 = arith.constant 3 : index
    %c0_74 = arith.constant 0 : index
    %c0_75 = arith.constant 0 : index
    %386 = vector.load %arg7[%c3_73, %c0_74, %c0_75] : memref<4x8x64xbf16, #tpu.memory_space<vmem>>, vector<1x8x64xbf16>
    %387 = vector.shape_cast %386 : vector<1x8x64xbf16> to vector<8x64xbf16>
    %cst_76 = arith.constant dense<0.000000e+00> : vector<16x64xf32>
    %388 = tpu.matmul %385, %387, %cst_76 {dimension_numbers = #tpu.dot_dimension_numbers<[1], [0], [0], [1], [0, 0, 1, 1], [], []>} : vector<16x8xbf16>, vector<8x64xbf16>, vector<16x64xf32> -> vector<16x64xf32>
    %389 = arith.addf %384, %388 : vector<16x64xf32>
    %c0_77 = arith.constant 0 : index
    %c0_78 = arith.constant 0 : index
    %390 = vector.load %arg8[%c0_77, %c0_78] : memref<1x64xf32, #tpu.memory_space<vmem>>, vector<1x64xf32>
    %391 = vector.broadcast %390 : vector<1x64xf32> to vector<16x64xf32>
    %392 = arith.addf %389, %391 : vector<16x64xf32>
    %cst_79 = arith.constant 0.000000e+00 : f32
    %393 = vector.broadcast %cst_79 : f32 to vector<16x64xf32>
    %394 = arith.cmpf ogt, %392, %393 : vector<16x64xf32>
    %cst_80 = arith.constant 0.000000e+00 : f32
    %395 = vector.broadcast %cst_80 : f32 to vector<16x64xf32>
    %396 = arith.minimumf %392, %395 : vector<16x64xf32>
    %397 = math.exp %396 : vector<16x64xf32>
    %cst_81 = arith.constant 1.000000e+00 : f32
    %398 = vector.broadcast %cst_81 : f32 to vector<16x64xf32>
    %399 = arith.subf %397, %398 : vector<16x64xf32>
    %400 = arith.select %394, %392, %399 : vector<16x64xi1>, vector<16x64xf32>
    %401 = arith.truncf %400 : vector<16x64xf32> to vector<16x64xbf16>
    %c0_82 = arith.constant 0 : index
    %c0_83 = arith.constant 0 : index
    %402 = vector.load %arg9[%c0_82, %c0_83] : memref<64x128xbf16, #tpu.memory_space<vmem>>, vector<64x128xbf16>
    %cst_84 = arith.constant dense<0.000000e+00> : vector<16x128xf32>
    %403 = tpu.matmul %401, %402, %cst_84 {dimension_numbers = #tpu.dot_dimension_numbers<[1], [0], [0], [1], [0, 0, 1, 1], [], []>} : vector<16x64xbf16>, vector<64x128xbf16>, vector<16x128xf32> -> vector<16x128xf32>
    %c0_85 = arith.constant 0 : index
    %c0_86 = arith.constant 0 : index
    %404 = vector.load %arg10[%c0_85, %c0_86] : memref<1x128xf32, #tpu.memory_space<vmem>>, vector<1x128xf32>
    %405 = vector.broadcast %404 : vector<1x128xf32> to vector<16x128xf32>
    %406 = arith.addf %403, %405 : vector<16x128xf32>
    %cst_87 = arith.constant 0.000000e+00 : f32
    %407 = vector.broadcast %cst_87 : f32 to vector<16x128xf32>
    %408 = arith.cmpf ogt, %406, %407 : vector<16x128xf32>
    %cst_88 = arith.constant 0.000000e+00 : f32
    %409 = vector.broadcast %cst_88 : f32 to vector<16x128xf32>
    %410 = arith.minimumf %406, %409 : vector<16x128xf32>
    %411 = math.exp %410 : vector<16x128xf32>
    %cst_89 = arith.constant 1.000000e+00 : f32
    %412 = vector.broadcast %cst_89 : f32 to vector<16x128xf32>
    %413 = arith.subf %411, %412 : vector<16x128xf32>
    %414 = arith.select %408, %406, %413 : vector<16x128xi1>, vector<16x128xf32>
    %415 = arith.truncf %414 : vector<16x128xf32> to vector<16x128xbf16>
    %c0_90 = arith.constant 0 : index
    %c0_91 = arith.constant 0 : index
    %c0_92 = arith.constant 0 : index
    %416 = vector.load %arg11[%c0_90, %c0_91, %c0_92] : memref<4x128x64xbf16, #tpu.memory_space<vmem>>, vector<1x128x64xbf16>
    %417 = vector.shape_cast %416 : vector<1x128x64xbf16> to vector<128x64xbf16>
    %cst_93 = arith.constant dense<0.000000e+00> : vector<16x64xf32>
    %418 = tpu.matmul %415, %417, %cst_93 {dimension_numbers = #tpu.dot_dimension_numbers<[1], [0], [0], [1], [0, 0, 1, 1], [], []>} : vector<16x128xbf16>, vector<128x64xbf16>, vector<16x64xf32> -> vector<16x64xf32>
    %c0_94 = arith.constant 0 : index
    %419 = memref.load %arg12[%c0_94] : memref<4xf32, #tpu.memory_space<smem>>
    %420 = vector.broadcast %419 : f32 to vector<16x64xf32>
    %421 = arith.addf %418, %420 : vector<16x64xf32>
    %cst_95 = arith.constant 0.000000e+00 : f32
    %422 = vector.broadcast %cst_95 : f32 to vector<16x64xf32>
    %423 = arith.cmpf ogt, %421, %422 : vector<16x64xf32>
    %cst_96 = arith.constant 0.000000e+00 : f32
    %424 = vector.broadcast %cst_96 : f32 to vector<16x64xf32>
    %425 = arith.minimumf %421, %424 : vector<16x64xf32>
    %426 = math.exp %425 : vector<16x64xf32>
    %cst_97 = arith.constant 1.000000e+00 : f32
    %427 = vector.broadcast %cst_97 : f32 to vector<16x64xf32>
    %428 = arith.subf %426, %427 : vector<16x64xf32>
    %429 = arith.select %423, %421, %428 : vector<16x64xi1>, vector<16x64xf32>
    %c1_98 = arith.constant 1 : index
    %c0_99 = arith.constant 0 : index
    %c0_100 = arith.constant 0 : index
    %430 = vector.load %arg11[%c1_98, %c0_99, %c0_100] : memref<4x128x64xbf16, #tpu.memory_space<vmem>>, vector<1x128x64xbf16>
    %431 = vector.shape_cast %430 : vector<1x128x64xbf16> to vector<128x64xbf16>
    %cst_101 = arith.constant dense<0.000000e+00> : vector<16x64xf32>
    %432 = tpu.matmul %415, %431, %cst_101 {dimension_numbers = #tpu.dot_dimension_numbers<[1], [0], [0], [1], [0, 0, 1, 1], [], []>} : vector<16x128xbf16>, vector<128x64xbf16>, vector<16x64xf32> -> vector<16x64xf32>
    %c1_102 = arith.constant 1 : index
    %433 = memref.load %arg12[%c1_102] : memref<4xf32, #tpu.memory_space<smem>>
    %434 = vector.broadcast %433 : f32 to vector<16x64xf32>
    %435 = arith.addf %432, %434 : vector<16x64xf32>
    %cst_103 = arith.constant 0.000000e+00 : f32
    %436 = vector.broadcast %cst_103 : f32 to vector<16x64xf32>
    %437 = arith.cmpf ogt, %435, %436 : vector<16x64xf32>
    %cst_104 = arith.constant 0.000000e+00 : f32
    %438 = vector.broadcast %cst_104 : f32 to vector<16x64xf32>
    %439 = arith.minimumf %435, %438 : vector<16x64xf32>
    %440 = math.exp %439 : vector<16x64xf32>
    %cst_105 = arith.constant 1.000000e+00 : f32
    %441 = vector.broadcast %cst_105 : f32 to vector<16x64xf32>
    %442 = arith.subf %440, %441 : vector<16x64xf32>
    %443 = arith.select %437, %435, %442 : vector<16x64xi1>, vector<16x64xf32>
    %c2_106 = arith.constant 2 : index
    %c0_107 = arith.constant 0 : index
    %c0_108 = arith.constant 0 : index
    %444 = vector.load %arg11[%c2_106, %c0_107, %c0_108] : memref<4x128x64xbf16, #tpu.memory_space<vmem>>, vector<1x128x64xbf16>
    %445 = vector.shape_cast %444 : vector<1x128x64xbf16> to vector<128x64xbf16>
    %cst_109 = arith.constant dense<0.000000e+00> : vector<16x64xf32>
    %446 = tpu.matmul %415, %445, %cst_109 {dimension_numbers = #tpu.dot_dimension_numbers<[1], [0], [0], [1], [0, 0, 1, 1], [], []>} : vector<16x128xbf16>, vector<128x64xbf16>, vector<16x64xf32> -> vector<16x64xf32>
    %c2_110 = arith.constant 2 : index
    %447 = memref.load %arg12[%c2_110] : memref<4xf32, #tpu.memory_space<smem>>
    %448 = vector.broadcast %447 : f32 to vector<16x64xf32>
    %449 = arith.addf %446, %448 : vector<16x64xf32>
    %cst_111 = arith.constant 0.000000e+00 : f32
    %450 = vector.broadcast %cst_111 : f32 to vector<16x64xf32>
    %451 = arith.cmpf ogt, %449, %450 : vector<16x64xf32>
    %cst_112 = arith.constant 0.000000e+00 : f32
    %452 = vector.broadcast %cst_112 : f32 to vector<16x64xf32>
    %453 = arith.minimumf %449, %452 : vector<16x64xf32>
    %454 = math.exp %453 : vector<16x64xf32>
    %cst_113 = arith.constant 1.000000e+00 : f32
    %455 = vector.broadcast %cst_113 : f32 to vector<16x64xf32>
    %456 = arith.subf %454, %455 : vector<16x64xf32>
    %457 = arith.select %451, %449, %456 : vector<16x64xi1>, vector<16x64xf32>
    %c3_114 = arith.constant 3 : index
    %c0_115 = arith.constant 0 : index
    %c0_116 = arith.constant 0 : index
    %458 = vector.load %arg11[%c3_114, %c0_115, %c0_116] : memref<4x128x64xbf16, #tpu.memory_space<vmem>>, vector<1x128x64xbf16>
    %459 = vector.shape_cast %458 : vector<1x128x64xbf16> to vector<128x64xbf16>
    %cst_117 = arith.constant dense<0.000000e+00> : vector<16x64xf32>
    %460 = tpu.matmul %415, %459, %cst_117 {dimension_numbers = #tpu.dot_dimension_numbers<[1], [0], [0], [1], [0, 0, 1, 1], [], []>} : vector<16x128xbf16>, vector<128x64xbf16>, vector<16x64xf32> -> vector<16x64xf32>
    %c3_118 = arith.constant 3 : index
    %461 = memref.load %arg12[%c3_118] : memref<4xf32, #tpu.memory_space<smem>>
    %462 = vector.broadcast %461 : f32 to vector<16x64xf32>
    %463 = arith.addf %460, %462 : vector<16x64xf32>
    %cst_119 = arith.constant 0.000000e+00 : f32
    %464 = vector.broadcast %cst_119 : f32 to vector<16x64xf32>
    %465 = arith.cmpf ogt, %463, %464 : vector<16x64xf32>
    %cst_120 = arith.constant 0.000000e+00 : f32
    %466 = vector.broadcast %cst_120 : f32 to vector<16x64xf32>
    %467 = arith.minimumf %463, %466 : vector<16x64xf32>
    %468 = math.exp %467 : vector<16x64xf32>
    %cst_121 = arith.constant 1.000000e+00 : f32
    %469 = vector.broadcast %cst_121 : f32 to vector<16x64xf32>
    %470 = arith.subf %468, %469 : vector<16x64xf32>
    %471 = arith.select %465, %463, %470 : vector<16x64xi1>, vector<16x64xf32>
    %c0_122 = arith.constant 0 : index
    %472 = memref.load %arg13[%c0_122] : memref<4xf32, #tpu.memory_space<smem>>
    %473 = vector.broadcast %472 : f32 to vector<16x8xf32>
    %474 = arith.mulf %473, %284 : vector<16x8xf32>
    %c0_123 = arith.constant 0 : index
    %475 = memref.load %arg13[%c0_123] : memref<4xf32, #tpu.memory_space<smem>>
    %476 = vector.broadcast %475 : f32 to vector<16x64xf32>
    %477 = arith.mulf %476, %429 : vector<16x64xf32>
    %c1_124 = arith.constant 1 : index
    %478 = memref.load %arg13[%c1_124] : memref<4xf32, #tpu.memory_space<smem>>
    %479 = vector.broadcast %478 : f32 to vector<16x8xf32>
    %480 = arith.mulf %479, %286 : vector<16x8xf32>
    %481 = arith.addf %474, %480 : vector<16x8xf32>
    %c1_125 = arith.constant 1 : index
    %482 = memref.load %arg13[%c1_125] : memref<4xf32, #tpu.memory_space<smem>>
    %483 = vector.broadcast %482 : f32 to vector<16x64xf32>
    %484 = arith.mulf %483, %443 : vector<16x64xf32>
    %485 = arith.addf %477, %484 : vector<16x64xf32>
    %c2_126 = arith.constant 2 : index
    %486 = memref.load %arg13[%c2_126] : memref<4xf32, #tpu.memory_space<smem>>
    %487 = vector.broadcast %486 : f32 to vector<16x8xf32>
    %488 = arith.mulf %487, %288 : vector<16x8xf32>
    %489 = arith.addf %481, %488 : vector<16x8xf32>
    %c2_127 = arith.constant 2 : index
    %490 = memref.load %arg13[%c2_127] : memref<4xf32, #tpu.memory_space<smem>>
    %491 = vector.broadcast %490 : f32 to vector<16x64xf32>
    %492 = arith.mulf %491, %457 : vector<16x64xf32>
    %493 = arith.addf %485, %492 : vector<16x64xf32>
    %c3_128 = arith.constant 3 : index
    %494 = memref.load %arg13[%c3_128] : memref<4xf32, #tpu.memory_space<smem>>
    %495 = vector.broadcast %494 : f32 to vector<16x8xf32>
    %496 = arith.mulf %495, %290 : vector<16x8xf32>
    %497 = arith.addf %489, %496 : vector<16x8xf32>
    %c3_129 = arith.constant 3 : index
    %498 = memref.load %arg13[%c3_129] : memref<4xf32, #tpu.memory_space<smem>>
    %499 = vector.broadcast %498 : f32 to vector<16x64xf32>
    %500 = arith.mulf %499, %471 : vector<16x64xf32>
    %501 = arith.addf %493, %500 : vector<16x64xf32>
    %502 = arith.truncf %497 : vector<16x8xf32> to vector<16x8xbf16>
    %c0_130 = arith.constant 0 : index
    %c0_131 = arith.constant 0 : index
    %503 = vector.load %arg15[%c0_130, %c0_131] : memref<8x64xbf16, #tpu.memory_space<vmem>>, vector<8x64xbf16>
    %cst_132 = arith.constant dense<0.000000e+00> : vector<16x64xf32>
    %504 = tpu.matmul %502, %503, %cst_132 {dimension_numbers = #tpu.dot_dimension_numbers<[1], [0], [0], [1], [0, 0, 1, 1], [], []>} : vector<16x8xbf16>, vector<8x64xbf16>, vector<16x64xf32> -> vector<16x64xf32>
    %505 = arith.truncf %501 : vector<16x64xf32> to vector<16x64xbf16>
    %c0_133 = arith.constant 0 : index
    %c0_134 = arith.constant 0 : index
    %506 = vector.load %arg16[%c0_133, %c0_134] : memref<64x64xbf16, #tpu.memory_space<vmem>>, vector<64x64xbf16>
    %cst_135 = arith.constant dense<0.000000e+00> : vector<16x64xf32>
    %507 = tpu.matmul %505, %506, %cst_135 {dimension_numbers = #tpu.dot_dimension_numbers<[1], [0], [0], [1], [0, 0, 1, 1], [], []>} : vector<16x64xbf16>, vector<64x64xbf16>, vector<16x64xf32> -> vector<16x64xf32>
    %508 = arith.addf %504, %507 : vector<16x64xf32>
    %c0_136 = arith.constant 0 : index
    %509 = memref.load %arg14[%c0_136] : memref<1xf32, #tpu.memory_space<smem>>
    %510 = vector.broadcast %509 : f32 to vector<16x64xf32>
    %511 = arith.addf %508, %510 : vector<16x64xf32>
    %512 = vector.shape_cast %511 : vector<16x64xf32> to vector<2x8x64xf32>
    %cst_137 = arith.constant dense<0.000000e+00> : vector<2x64xf32>
    %513 = vector.multi_reduction <add>, %512, %cst_137 [1] : vector<2x8x64xf32> to vector<2x64xf32>
    %cst_138 = arith.constant 8.000000e+00 : f32
    %514 = vector.broadcast %cst_138 : f32 to vector<2x64xf32>
    %515 = arith.divf %513, %514 : vector<2x64xf32>
    %c0_139 = arith.constant 0 : index
    %c0_140 = arith.constant 0 : index
    %c0_141 = arith.constant 0 : index
    %516 = vector.load %arg17[%c0_139, %c0_140, %c0_141] : memref<1x2x64xf32, #tpu.memory_space<vmem>>, vector<1x2x64xf32>
    %517 = vector.shape_cast %516 : vector<1x2x64xf32> to vector<2x64xf32>
    %518 = vector.shape_cast %515 : vector<2x64xf32> to vector<1x2x64xf32>
    tpu.vector_store %arg17[%c0_139, %c0_140, %c0_141], %518 {strides = array<i32>} : memref<1x2x64xf32, #tpu.memory_space<vmem>>, vector<1x2x64xf32>,
    return
  }
  func.func @transform_0(%arg0: i32) -> (i32, i32, i32) {
    %c0_i32 = arith.constant 0 : i32
    %c0_i32_0 = arith.constant 0 : i32
    %c0_i32_1 = arith.constant 0 : i32
    return %c0_i32, %arg0, %c0_i32_0 : i32, i32, i32
  }
  func.func @transform_1(%arg0: i32) -> i32 {
    %c0_i32 = arith.constant 0 : i32
    %c0_i32_0 = arith.constant 0 : i32
    return %c0_i32 : i32
  }
  func.func @transform_2(%arg0: i32) -> i32 {
    %c0_i32 = arith.constant 0 : i32
    %c0_i32_0 = arith.constant 0 : i32
    return %c0_i32 : i32
  }
  func.func @transform_3(%arg0: i32) -> (i32, i32) {
    %c0_i32 = arith.constant 0 : i32
    %c0_i32_0 = arith.constant 0 : i32
    %c0_i32_1 = arith.constant 0 : i32
    return %c0_i32, %c0_i32_0 : i32, i32
  }
  func.func @transform_4(%arg0: i32) -> (i32, i32) {
    %c0_i32 = arith.constant 0 : i32
    %c0_i32_0 = arith.constant 0 : i32
    %c0_i32_1 = arith.constant 0 : i32
    return %c0_i32, %c0_i32_0 : i32, i32
  }
  func.func @transform_5(%arg0: i32) -> (i32, i32) {
    %c0_i32 = arith.constant 0 : i32
    %c0_i32_0 = arith.constant 0 : i32
    %c0_i32_1 = arith.constant 0 : i32
    return %c0_i32, %c0_i32_0 : i32, i32
  }
  func.func @transform_6(%arg0: i32) -> (i32, i32, i32) {
    %c0_i32 = arith.constant 0 : i32
    %c0_i32_0 = arith.constant 0 : i32
    %c0_i32_1 = arith.constant 0 : i32
    %c0_i32_2 = arith.constant 0 : i32
    return %c0_i32, %c0_i32_0, %c0_i32_1 : i32, i32, i32
  }
  func.func @transform_7(%arg0: i32) -> (i32, i32) {
    %c0_i32 = arith.constant 0 : i32
    %c0_i32_0 = arith.constant 0 : i32
    %c0_i32_1 = arith.constant 0 : i32
    return %c0_i32, %c0_i32_0 : i32, i32
  }
  func.func @transform_8(%arg0: i32) -> (i32, i32) {
    %c0_i32 = arith.constant 0 : i32
    %c0_i32_0 = arith.constant 0 : i32
    %c0_i32_1 = arith.constant 0 : i32
    return %c0_i32, %c0_i32_0 : i32, i32
  }
  func.func @transform_9(%arg0: i32) -> (i32, i32) {
    %c0_i32 = arith.constant 0 : i32
    %c0_i32_0 = arith.constant 0 : i32
    %c0_i32_1 = arith.constant 0 : i32
    return %c0_i32, %c0_i32_0 : i32, i32
  }
  func.func @transform_10(%arg0: i32) -> (i32, i32, i32) {
    %c0_i32 = arith.constant 0 : i32
    %c0_i32_0 = arith.constant 0 : i32
    %c0_i32_1 = arith.constant 0 : i32
    %c0_i32_2 = arith.constant 0 : i32
    return %c0_i32, %c0_i32_0, %c0_i32_1 : i32, i32, i32
  }
  func.func @transform_11(%arg0: i32) -> i32 {
    %c0_i32 = arith.constant 0 : i32
    %c0_i32_0 = arith.constant 0 : i32
    return %c0_i32 : i32
  }
  func.func @transform_12(%arg0: i32) -> i32 {
    %c0_i32 = arith.constant 0 : i32
    %c0_i32_0 = arith.constant 0 : i32
    return %c0_i32 : i32
  }
  func.func @transform_13(%arg0: i32) -> i32 {
    %c0_i32 = arith.constant 0 : i32
    %c0_i32_0 = arith.constant 0 : i32
    return %c0_i32 : i32
  }
  func.func @transform_14(%arg0: i32) -> (i32, i32) {
    %c0_i32 = arith.constant 0 : i32
    %c0_i32_0 = arith.constant 0 : i32
    %c0_i32_1 = arith.constant 0 : i32
    return %c0_i32, %c0_i32_0 : i32, i32
  }
  func.func @transform_15(%arg0: i32) -> (i32, i32) {
    %c0_i32 = arith.constant 0 : i32
    %c0_i32_0 = arith.constant 0 : i32
    %c0_i32_1 = arith.constant 0 : i32
    return %c0_i32, %c0_i32_0 : i32, i32
  }
  func.func @transform_16(%arg0: i32) -> (i32, i32, i32) {
    %c0_i32 = arith.constant 0 : i32
    %c0_i32_0 = arith.constant 0 : i32
    %c0_i32_1 = arith.constant 0 : i32
    return %arg0, %c0_i32, %c0_i32_0 : i32, i32, i32
  }
}

</mosaic_0001>

<bundles_post_ra>
// kernel: tpu_custom_call.1
= control target key start
LH: loop header
LB: loop body
LE: loop exit
PB: predicated region body
PF: predicated region fallthrough
CT: control target
= control target key end

     0   :  { %s4700_s0 = inlined_call_operand.vmem [shape: bf16[4,32,64], index: 0, kind: input, shape index: {}]   ;;  %s4701_s1 = inlined_call_operand.vmem [shape: f32[64], index: 1, kind: input, shape index: {}]   ;;  %s4702_s2 = inlined_call_operand.vmem [shape: f32[16], index: 2, kind: input, shape index: {}]   ;;  %s4703_s3 = inlined_call_operand.vmem [shape: bf16[64,32], index: 3, kind: input, shape index: {}]   ;;  %s4704_s4 = inlined_call_operand.vmem [shape: bf16[32,16], index: 4, kind: input, shape index: {}]   ;;  %s4705_s5 = inlined_call_operand.vmem [shape: bf16[16,8], index: 5, kind: input, shape index: {}]   ;;  %s4706_s6 = inlined_call_operand.vmem [shape: bf16[4,8,64], index: 6, kind: input, shape index: {}]   ;;  %s4707_s7 = inlined_call_operand.vmem [shape: f32[1,64], index: 7, kind: input, shape index: {}]   ;;  %s4708_s8 = inlined_call_operand.vmem [shape: bf16[64,128], index: 8, kind: input, shape index: {}]   ;;  %s4709_s9 = inlined_call_operand.vmem [shape: f32[1,128], index: 9, kind: input, shape index: {}]   ;;  %s4710_s10 = inlined_call_operand.vmem [shape: bf16[4,128,64], index: 10, kind: input, shape index: {}]   ;;  %s4711_s11 = inlined_call_operand.vmem [shape: f32[4], index: 11, kind: input, shape index: {}]   ;;  %s4712_s12 = inlined_call_operand.vmem [shape: f32[4], index: 12, kind: input, shape index: {}]   ;;  %s4713_s13 = inlined_call_operand.<no memory space> [shape: f32[1], index: 13, kind: input, shape index: {}]   ;;  %s4714_s14 = inlined_call_operand.vmem [shape: bf16[8,64], index: 14, kind: input, shape index: {}]   ;;  %s4715_s15 = inlined_call_operand.vmem [shape: bf16[64,64], index: 15, kind: input, shape index: {}]   ;;  %s4716_s16 = inlined_call_operand.hbm [shape: f32[2,2,64], index: 16, kind: output, shape index: {}]  }
   0x1   :  { %4725 = sst [smem:[#allocation21_spill]] %s4700_s0 }
   0x2   :  { %4726 = sst [smem:[#allocation22_spill]] %s4701_s1 }
   0x3   :  { %4727 = sst [smem:[#allocation23_spill]] %s4702_s2 }
   0x4   :  { %4728 = sst [smem:[#allocation24_spill]] %s4703_s3 }
   0x5   :  { %4729 = sst [smem:[#allocation25_spill]] %s4704_s4 }
   0x6   :  { %4730 = sst [smem:[#allocation26_spill]] %s4705_s5 }
   0x7   :  { %4731 = sst [smem:[#allocation27_spill]] %s4711_s11 }
   0x8   :  { %4732 = sst [smem:[#allocation28_spill]] %s4712_s12 }
   0x9   :  { %4733 = sst [smem:[#allocation29_spill]] %s4716_s16 }
   0xa   :  { %21 = sst [smem:[#allocation2]] %s4713_s13 }
   0xb   :  { %22 = vsyncpa [#allocation6], 0 }
   0xc   :  { %23 = vsyncpa [#allocation8], 0 }
   0xd   :  { %24 = vsyncpa [#allocation11], 0 }
   0xe   :  { %25 = vsyncpa [#allocation5], 0 }
   0xf   :  { %27 = vsyncpa [#allocation5 + $0x1], 0  ;;  %s3803_s23 = smov 0   ;;  %s3805_s24 = smov 0  }
  0x10   :  { %s3807_s25 = smov 0   ;;  %s3809_s26 = smov 0  }
  0x11 LB: > { %4734 = sst [smem:[#allocation17_spill]] %s3694_s23  ;;  %s3824_s13 = sadd.s32 4294967295, %s3706_s26   ;;  %s3706_s26 = sphi %s3809_s26, %s4764_s26   ;;  %s3702_s25 = sphi %s3807_s25, %s4768_s25   ;;  %s3698_s24 = sphi %s3805_s24, %s4767_s24   ;;  %s3694_s23 = sphi %s3803_s23, %s4766_s23  }
  0x12   : > { %s2823_s27 = sadd.s32 4294967294, %s3706_s26   ;;  %s3828_s28 = sadd.s32 1, %s3706_s26  }
  0x13   : > { %4735 = sst [smem:[#allocation18_spill]] %s3828_s28  ;;  %s40_s29 = sadd.s32 1, %s3702_s25 }
  0x14   : > { %s37_s30 = ssub.s32 %s3706_s26, %s3828_s28  ;;  %p47_p0 = scmp.ne.s32.totalorder %s3702_s25, %s3698_s24 }
  0x15   : > { %p38_p1 = scmp.eq.s32.totalorder %s37_s30, 0  ;;  %p48_p2 = scmp.eq.s32.totalorder %s3706_s26, 0 }
  0x16   : > { %p392_p3 = scmp.eq.s32.totalorder %s3824_s13, 1  ;;  %p397_p4 = scmp.ne.s32.totalorder %s3698_s24, %s3694_s23 }
  0x17   : > { %s3840_s0 = scalar_select %p38_p1, %s3702_s25, %s40_s29  }
  0x18   : > { %p3842_p5 = por %p48_p2, %p47_p0  ;;  %p3846_p6 = por %p392_p3, %p47_p0 }
  0x19   : > { %4736 = sst [smem:[#allocation19_spill]] %s3840_s0  ;;  %p398_p7 = scmp.eq.s32.totalorder %s2823_s27, 1 }
  0x1a   : > { %s4737_s17 = scalar_select %p3842_p5, 1, 0 }
  0x1b   : > { %s4738_s18 = scalar_select %p3846_p6, 1, 0 }
  0x1c   : > { %p2824_p8 = scmp.ge.s32.totalorder %s3706_s26, 1  ;;  %p405_p9 = scmp.lt.s32.totalorder %s3706_s26, 3 }
  0x1d   : > { %p3852_p10 = por %p398_p7, %p397_p4  ;;  %p4722_p11 = scmp.eq.s32.totalorder %s3824_s13, 0 }
  0x1e   : > { %p3857_p12 = pnand %p2824_p8, %p405_p9  ;;  %s4742_s2 = sld [smem:[#allocation23_spill]] }
  0x1f   : > { %s4739_s19 = scalar_select %p3852_p10, 1, 0 }
  0x20   : > { %s4741_s20 = scalar_select %p3857_p12, 1, 0 }
  0x21   : > { %4740 = sst [smem:[#allocation20_spill]] %s4739_s19  ;;  %p3437_p13 = pneg %p3857_p12 }
  0x22   : > { %s4743_s1 = sld [smem:[#allocation22_spill]]  ;;  %s4745_s11 = sld [smem:[#allocation27_spill]] }
  0x23   : > { %p3871_p0 = pnand %p4722_p11, %p3437_p13  ;;  %s4746_s12 = sld [smem:[#allocation28_spill]] }
  0x24   : > { %s429_s29 = sshll.u32 %s4742_s2, 4  ;;  %s430_s29 = int_to_ptr.vmem [resolvable:$true] %s429_s29 }
  0x25   : > { %s3572_s27 = scalar_lea.vmem %s430_s29, 16  ;;  %p3574_p2 = pneg %p3871_p0 }
  0x26   : > { %p3573_p1 = scmp.ne.s32.totalorder %s430_s29, %s3572_s27  ;;  %p3580_p7 = scmp.lt.s32.totalorder %s430_s29, %s430_s29 }
  0x27   : > { %p3581_p8 = scmp.lt.s32.totalorder %s3572_s27, %s3572_s27 }
  0x28   : > { %s418_s0 = sshll.u32 %s4743_s1, 4  ;;  %s464_s21 = sshll.u32 %s4745_s11, 4  ;;  %s419_s0 = int_to_ptr.vmem [resolvable:$true] %s418_s0  ;;  %s3878_s21 = int_to_ptr.vmem [resolvable:$true] %s464_s21 }
  0x29   : > { %s475_s16 = sshll.u32 %s4746_s12, 4  ;;  %p3575_p3 = pnand %p3574_p2, %p3573_p1  ;;  %s476_s16 = int_to_ptr.vmem [resolvable:$true] %s475_s16 }
  0x2a   : > { %p3582_p9 = por %p3581_p8, %p3580_p7 }
  0x2b   : > { %p3576_p4 = pneg %p3575_p3 }
  0x2d   : > { %p3583_p13 = pnand %p3582_p9, %p3576_p4 }
  0x2f   : > { %3586 = shalt.err (!%p3583_p13)
}
  0x30   : > { %s3708_s23 = smov [#allocation7]   ;;  %s3587_s2 = scalar_lea.vmem %s419_s0, 16 }
  0x31   : > { %3443 = dma.vmem_to_smem (!%p3871_p0), %s430_s29, 16, %s3708_s23, [#allocation8]  }
  0x32   : > { %p3588_p11 = scmp.ne.s32.totalorder %s419_s0, %s3587_s2  ;;  %p3595_p12 = scmp.lt.s32.totalorder %s419_s0, %s419_s0 }
  0x33   : > { %p3596_p5 = scmp.lt.s32.totalorder %s3587_s2, %s3587_s2 }
  0x34   : > { %p3590_p10 = pnand %p3588_p11, %p3574_p2 }
  0x35   : > { %p3597_p1 = por %p3596_p5, %p3595_p12 }
  0x36   : > { %p3591_p6 = pneg %p3590_p10 }
  0x38   : > { %p3598_p3 = pnand %p3597_p1, %p3591_p6 }
  0x3a   : > { %3601 = shalt.err (!%p3598_p3)
}
  0x3b   : > { %s3709_s19 = smov [#allocation4]   ;;  %s3602_s29 = scalar_lea.vmem %s3878_s21, 16 }
  0x3c   : > { %3440 = dma.vmem_to_smem (!%p3871_p0), %s419_s0, 16, %s3709_s19, [#allocation6]  }
  0x3d   : > { %p3603_p4 = scmp.ne.s32.totalorder %s3878_s21, %s3602_s29  ;;  %p3610_p10 = scmp.lt.s32.totalorder %s3878_s21, %s3878_s21 }
  0x3e   : > { %p3611_p8 = scmp.lt.s32.totalorder %s3602_s29, %s3602_s29 }
  0x3f   : > { %p3605_p7 = pnand %p3603_p4, %p3574_p2 }
  0x40   : > { %p3612_p5 = por %p3611_p8, %p3610_p10 }
  0x41   : > { %p3606_p11 = pneg %p3605_p7 }
  0x43   : > { %p3613_p6 = pnand %p3612_p5, %p3606_p11 }
  0x45   : > { %3616 = shalt.err (!%p3613_p6)
}
  0x46   : > { %s3710_s30 = smov [#allocation9]   ;;  %s3617_s27 = scalar_lea.vmem %s476_s16, 16 }
  0x47   : > { %3446 = dma.vmem_to_smem (!%p3871_p0), %s3878_s21, 16, %s3710_s30, [#allocation8]  }
  0x48   : > { %p3618_p12 = scmp.ne.s32.totalorder %s476_s16, %s3617_s27  ;;  %p3625_p1 = scmp.lt.s32.totalorder %s476_s16, %s476_s16 }
  0x49   : > { %p3626_p3 = scmp.lt.s32.totalorder %s3617_s27, %s3617_s27 }
  0x4a   : > { %p3620_p9 = pnand %p3618_p12, %p3574_p2 }
  0x4b   : > { %p3627_p4 = por %p3626_p3, %p3625_p1 }
  0x4c   : > { %p3621_p13 = pneg %p3620_p9 }
  0x4e   : > { %p3628_p7 = pnand %p3627_p4, %p3621_p13 }
  0x50   : > { %3631 = shalt.err (!%p3628_p7)
}
  0x51   : > { %s3711_s23 = smov [#allocation10]   ;;  %p2829_p11 = scmp.ge.s32.totalorder %s3706_s26, 2 }
  0x52   : > { %3449 = dma.vmem_to_smem (!%p3871_p0), %s476_s16, 16, %s3711_s23, [#allocation11]  }
  0x53   : > { %491 = sbr.rel (%p2829_p11) target bundleno = 102 (0x66), region = 76  ;;  %p4747_p10 = scmp.ne.s32.totalorder (!%p2829_p11), %s4737_s17, 0 }
  0x5a   : > { %494 = sbr.rel (!%p4747_p10) target bundleno = 102 (0x66), region = 80  ;;  %s496_s21 = sand.u32 (%p4747_p10), 1, %s3702_s25  }
  0x5b   : > { %s3065_s2 = sshll.u32 (%p4747_p10), %s3706_s26, 3  ;;  %s2830_s19 = sshll.u32 (%p4747_p10), %s496_s21, 5 }
  0x5c   : > { %s4748_s22 = sld [smem:[#allocation21_spill]] (%p4747_p10)  ;;  %s498_s16 = scalar_lea.vmem (%p4747_p10), [#allocation3], %s2830_s19 }
  0x62   : > { %s501_s0 = scalar_lea.vmem %s4748_s22, %s3065_s2 }
  0x63   : > { %v517_v0 = vld [vmem:[%s501_s0] sm:$0xff]   ;;  %v521_v1 = vld [vmem:[%s501_s0 + $0x10] sm:$0xff]  }
  0x64   : > { %v525_v2 = vld [vmem:[%s501_s0 + $0x20] sm:$0xff]   ;;  %518 = vst [vmem:[%s498_s16] sm:$0xff] %v517_v0   ;;  %522 = vst [vmem:[%s498_s16 + $0x8] sm:$0xff] %v521_v1   ;;  %v529_v3 = vld [vmem:[%s501_s0 + $0x30] sm:$0xff]  }
  0x65   : > { %526 = vst [vmem:[%s498_s16 + $0x10] sm:$0xff] %v525_v2   ;;  %530 = vst [vmem:[%s498_s16 + $0x18] sm:$0xff] %v529_v3  }
  0x66 PF: > { %p4749_p0 = scmp.ne.s32.totalorder %s4741_s20, 0 }
  0x67   : > { %s3927_s28 = sand.u32 (!%p4749_p0), 1, %s3698_s24   ;;  %p4750_p2 = scmp.eq.s32.totalorder (!%p4749_p0), %s3824_s13, 0 }
  0x68   : > { %574 = sbr.rel (%p4749_p0) target bundleno = 1869 (0x74d), region = 121  ;;  %s2834_s17 = sshll.u32 (!%p4749_p0), %s3927_s28, 5 }
  0x69   : > { %s579_s27 = scalar_lea.vmem (!%p4749_p0), [#allocation3], %s2834_s17 }
  0x6f   : > { %3677 = dma.done.wait (%p4750_p2), [#allocation6], 16   ;;  %p4751_p8 = pmov %p4750_p2 }
  0x70   : > { %p4752_p5 = pmov %p4750_p2 }
  0x71   : > { %3679 = vsyncadd (%p4751_p8), [#allocation6], 4294967280 }
  0x72   : > { %3681 = dma.done.wait (%p4752_p5), [#allocation8], 32   ;;  %p4753_p6 = pmov %p4750_p2 }
  0x73   : > { %p4754_p12 = pmov %p4750_p2 }
  0x74   : > { %3683 = vsyncadd (%p4753_p6), [#allocation8], 4294967264 }
  0x75   : > { %3685 = dma.done.wait (%p4754_p12), [#allocation11], 16   ;;  %p4755_p9 = pmov %p4750_p2 }
  0x77   : > { %3687 = vsyncadd (%p4755_p9), [#allocation11], 4294967280 }
  0x78   : > { %599 = sfence }
  0x79   : > { %s4756_s3 = sld [smem:[#allocation24_spill]]  ;;  %v3712_v5 = vmov 0.0   ;;  %vm3713_vm0 = vmmov 0   ;;  %v3067_v8 = vld [vmem:[%s579_s27] sm:$0xff]   ;;  %v3082_v9 = vld [vmem:[%s579_s27 + $0x8] sm:$0xff]   ;;  %s3967_s30 = sld [smem:[#allocation4]] }
  0x7a   : > { %3181 = vmatprep.subr.bf16.mxu0 %v3712_v5  ;;  %3193 = vmatprep.subr.bf16.mxu1 %v3712_v5  ;;  %v3083_v10 = vld [vmem:[%s579_s27 + $0x10] sm:$0xff]   ;;  %v3084_v11 = vld [vmem:[%s579_s27 + $0x18] sm:$0xff]   ;;  %s3969_s22 = sld [smem:[#allocation4 + $0x1]]  ;;  %s3971_s0 = sld [smem:[#allocation4 + $0x2]]  ;;  %v3981_v12 = vunpack.c.l.bf16 %v3067_v8  ;;  %v3983_v13 = vunpack.c.h.bf16 %v3067_v8  ;;  %v3989_v14 = vunpack.c.l.bf16 %v3082_v9  ;;  %v3991_v15 = vunpack.c.h.bf16 %v3082_v9 }
  0x7b   : > { %3189 = vmatprep.mubr.msk.bf16.mxu0 %vm3713_vm0, %v3712_v5  ;;  %3201 = vmatprep.mubr.msk.bf16.mxu1 %vm3713_vm0, %v3712_v5  ;;  %s3975_s16 = sld [smem:[#allocation4 + $0x3]]  ;;  %s3977_s17 = sld [smem:[#allocation7]]  ;;  %v3993_v16 = vunpack.c.l.bf16 %v3083_v10  ;;  %v3995_v17 = vunpack.c.h.bf16 %v3083_v10  ;;  %v4008_v19 = vunpack.c.l.bf16 %v3084_v11  ;;  %v4010_v20 = vunpack.c.h.bf16 %v3084_v11 }
  0x7c   : > { %s3985_s27 = sld [smem:[#allocation4 + $0x4]]  ;;  %s3987_s20 = sld [smem:[#allocation4 + $0x5]]  ;;  %vm809_vm1 = vcmask 523264   ;;  %vm1118_vm2 = vcmask 261120   ;;  %vm1419_vm3 = vcmask 130048   ;;  %vm1720_vm4 = vcmask 1043456  }
  0x7d   : > { %s3997_s23 = sld [smem:[#allocation4 + $0x6]]  ;;  %s3999_s21 = sld [smem:[#allocation4 + $0x7]]  ;;  %vm1716_vm5 = vcmask 64512  }
  0x7e   : > { %s4013_s29 = sld [smem:[#allocation7 + $0x1]]  ;;  %s4015_s1 = sld [smem:[#allocation4 + $0x8]] }
  0x7f   : > { %v3945_v4 = vld [vmem:[%s4756_s3] sm:$0xff]   ;;  %v3954_v6 = vld [vmem:[%s4756_s3 + $0x8] sm:$0xff]   ;;  %v3961_v7 = vld [vmem:[%s4756_s3 + $0x10] sm:$0xff]   ;;  %v659_v21 = vstv %s3967_s30  ;;  %s4023_s2 = sld [smem:[#allocation4 + $0x9]]  ;;  %s4025_s30 = sld [smem:[#allocation4 + $0xa]] }
  0x80   : > { %3182 = vmatpush3.bf16.msra.mxu0 %v3945_v4  ;;  %3194 = vmatpush3.bf16.msra.mxu1 %v3945_v4  ;;  %v4004_v18 = vld [vmem:[%s4756_s3 + $0x18] sm:$0xff]   ;;  %v660_v22 = vmul.f32 %v3981_v12, %v659_v21  ;;  %v661_v23 = vmul.f32 %v3983_v13, %v659_v21  ;;  %v665_v24 = vstv %s3969_s22  ;;  %v673_v25 = vstv %s3971_s0  ;;  %s4031_s19 = sld [smem:[#allocation4 + $0xb]]  ;;  %s4033_s3 = sld [smem:[#allocation7 + $0x2]] }
  0x81   : > { %3183 = vmatprep.subr.bf16.mxu0 %v3712_v5  ;;  %3195 = vmatprep.subr.bf16.mxu1 %v3712_v5  ;;  %v666_v26 = vmul.f32 %v3989_v14, %v665_v24  ;;  %v667_v27 = vmul.f32 %v3991_v15, %v665_v24  ;;  %v674_v28 = vmul.f32 %v3993_v16, %v673_v25  ;;  %v681_v30 = vstv %s3975_s16  ;;  %s4039_s22 = sld [smem:[#allocation4 + $0xc]]  ;;  %s4041_s0 = sld [smem:[#allocation4 + $0xd]] }
  0x82   : > { %v675_v29 = vmul.f32 %v3995_v17, %v673_v25  ;;  %v687_v31 = vstv %s3977_s17  ;;  %v693_v32 = vstv %s3985_s27  ;;  %v697_v33 = vstv %s3987_s20  ;;  %s4047_s11 = sld [smem:[#allocation4 + $0xe]]  ;;  %s4065_s16 = sld [smem:[#allocation4 + $0xf]] }
  0x83   : > { %v668_v34 = vadd.f32 %v666_v26, %v660_v22  ;;  %v669_v35 = vadd.f32 %v667_v27, %v661_v23  ;;  %v682_v36 = vmul.f32 %v4008_v19, %v681_v30  ;;  %v703_v37 = vstv %s3997_s23  ;;  %s4067_s17 = sld [smem:[#allocation7 + $0x3]]  ;;  %s4138_s20 = sld [smem:[#allocation4 + $0x10]] }
  0x84   : > { %3184 = vmatpush3.bf16.msra.mxu0 %v3954_v6  ;;  %3196 = vmatpush3.bf16.msra.mxu1 %v3954_v6  ;;  %v683_v38 = vmul.f32 %v4010_v20, %v681_v30  ;;  %v694_v39 = vmul.f32 %v3981_v12, %v693_v32  ;;  %v695_v40 = vmul.f32 %v3983_v13, %v693_v32  ;;  %v709_v41 = vstv %s3999_s21  ;;  %s4757_s4 = sld [smem:[#allocation25_spill]]  ;;  %s4140_s23 = sld [smem:[#allocation4 + $0x14]] }
  0x85   : > { %3185 = vmatprep.subr.bf16.mxu0 %v3712_v5  ;;  %3197 = vmatprep.subr.bf16.mxu1 %v3712_v5  ;;  %v676_v42 = vadd.f32 %v674_v28, %v668_v34  ;;  %v677_v43 = vadd.f32 %v675_v29, %v669_v35  ;;  %v698_v44 = vmul.f32 %v3989_v14, %v697_v33  ;;  %v715_v54 = vstv %s4013_s29  ;;  %s4142_s21 = sld [smem:[#allocation4 + $0x18]]  ;;  %s4144_s29 = sld [smem:[#allocation4 + $0x1c]] }
  0x86   : > { %v699_v45 = vmul.f32 %v3991_v15, %v697_v33  ;;  %v704_v46 = vmul.f32 %v3993_v16, %v703_v37  ;;  %v705_v47 = vmul.f32 %v3995_v17, %v703_v37  ;;  %v710_v48 = vmul.f32 %v4008_v19, %v709_v41  ;;  %s4174_s27 = sld [smem:[#allocation4 + $0x1b]]  ;;  %s4758_s5 = sld [smem:[#allocation26_spill]] }
  0x87   : > { %v711_v49 = vmul.f32 %v4010_v20, %v709_v41  ;;  %v684_v50 = vadd.f32 %v682_v36, %v676_v42  ;;  %v685_v51 = vadd.f32 %v683_v38, %v677_v43  ;;  %v700_v52 = vadd.f32 %v698_v44, %v694_v39  ;;  %s4269_s12 = sld [smem:[#allocation7 + $0x9]]  ;;  %p4760_p1 = scmp.ne.s32.totalorder %s4738_s18, 0 }
  0x88   : > { %3186 = vmatpush3.bf16.msra.mxu0 %v3961_v7  ;;  %3198 = vmatpush3.bf16.msra.mxu1 %v3961_v7  ;;  %v701_v53 = vadd.f32 %v699_v45, %v695_v40  ;;  %v721_v55 = vstv %s4015_s1  ;;  %v725_v56 = vstv %s4023_s2  ;;  %v731_v57 = vstv %s4025_s30  ;;  %s4146_s2 = sld [smem:[#allocation4 + $0x11]]  ;;  %s4148_s30 = sld [smem:[#allocation4 + $0x15]] }
  0x89   : > { %3187 = vmatprep.subr.bf16.mxu0 %v3712_v5  ;;  %3199 = vmatprep.subr.bf16.mxu1 %v3712_v5  ;;  %v688_v58 = vadd.f32 %v687_v31, %v684_v50  ;;  %v689_v59 = vadd.f32 %v687_v31, %v685_v51  ;;  %v706_v60 = vadd.f32 %v704_v46, %v700_v52  ;;  %v737_v26 = vstv %s4031_s19  ;;  %s4150_s19 = sld [smem:[#allocation4 + $0x19]]  ;;  %s4168_s1 = sld [smem:[#allocation4 + $0x1e]] }
  0x8a   : > { %v707_v61 = vadd.f32 %v705_v47, %v701_v53  ;;  %v722_v62 = vmul.f32 %v3981_v12, %v721_v55  ;;  %v723_v63 = vmul.f32 %v3983_v13, %v721_v55  ;;  %v726_v0 = vmul.f32 %v3989_v14, %v725_v56 }
  0x8b   : > { %v727_v1 = vmul.f32 %v3991_v15, %v725_v56  ;;  %v690_v2 = vmax.f32 %v688_v58, 0.0  ;;  %v691_v3 = vmax.f32 %v689_v59, 0.0  ;;  %v712_v8 = vadd.f32 %v710_v48, %v706_v60 }
  0x8c   : > { %3188 = vmatpush3.bf16.msra.mxu0 %v4004_v18  ;;  %3200 = vmatpush3.bf16.msra.mxu1 %v4004_v18  ;;  %v713_v9 = vadd.f32 %v711_v49, %v707_v61  ;;  %v728_v10 = vadd.f32 %v726_v0, %v722_v62  ;;  %v732_v21 = vmul.f32 %v3993_v16, %v731_v57  ;;  %v743_v33 = vstv %s4033_s3  ;;  %s4170_s3 = sld [smem:[#allocation4 + $0x13]] }
  0x8d   : > { %3205 = vmatprep.subr.bf16.mxu0 %v3712_v5  ;;  %3217 = vmatprep.subr.bf16.mxu1 %v3712_v5  ;;  %v729_v11 = vadd.f32 %v727_v1, %v723_v63  ;;  %v733_v22 = vmul.f32 %v3995_v17, %v731_v57  ;;  %v784_v23 = vpack.c.bf16 %v691_v3, %v690_v2  ;;  %v749_v34 = vstv %s4039_s22  ;;  %s4152_s22 = sld [smem:[#allocation4 + $0x1d]] }
  0x8e   : > { %v716_v24 = vadd.f32 %v715_v54, %v712_v8  ;;  %v717_v25 = vadd.f32 %v715_v54, %v713_v9  ;;  %v734_v27 = vadd.f32 %v732_v21, %v728_v10  ;;  %v738_v29 = vmul.f32 %v4008_v19, %v737_v26 }
  0x8f   : > { %v735_v28 = vadd.f32 %v733_v22, %v729_v11  ;;  %v739_v30 = vmul.f32 %v4010_v20, %v737_v26  ;;  %3190 = vmatmul.mubr.msk.bf16.vlgmr.msra.gmra.mrb[0].mxu0 %vm809_vm1, %v784_v23  ;;  %v750_v37 = vmul.f32 %v3981_v12, %v749_v34  ;;  %v753_v38 = vstv %s4041_s0  ;;  %s4162_s0 = sld [smem:[#allocation4 + $0x12]] }
  0x90   : > { %v718_v31 = vmax.f32 %v716_v24, 0.0  ;;  %v719_v32 = vmax.f32 %v717_v25, 0.0  ;;  %3206 = vmatpush3.bf16.msra.mxu0 %v3945_v4  ;;  %3213 = vmatprep.mubr.msk.bf16.mxu0 %vm3713_vm0, %v3712_v5  ;;  %v740_v35 = vadd.f32 %v738_v29, %v734_v27  ;;  %v751_v40 = vmul.f32 %v3983_v13, %v749_v34 }
  0x91   : > { %v741_v36 = vadd.f32 %v739_v30, %v735_v28  ;;  %3207 = vmatprep.subr.bf16.mxu0 %v3712_v5  ;;  %v754_v41 = vmul.f32 %v3989_v14, %v753_v38  ;;  %v755_v42 = vmul.f32 %v3991_v15, %v753_v38  ;;  %v759_v45 = vstv %s4047_s11  ;;  %s4172_s11 = sld [smem:[#allocation4 + $0x17]] }
  0x92   : > { %v854_v39 = vpack.c.bf16 %v719_v32, %v718_v31  ;;  %v744_v43 = vadd.f32 %v743_v33, %v740_v35  ;;  %v765_v46 = vstv %s4065_s16  ;;  %v760_v12 = vmul.f32 %v3993_v16, %v759_v45  ;;  %s4164_s16 = sld [smem:[#allocation4 + $0x16]] }
  0x93   : > { %v745_v44 = vadd.f32 %v743_v33, %v741_v36  ;;  %v756_v47 = vadd.f32 %v754_v41, %v750_v37  ;;  %v757_v48 = vadd.f32 %v755_v42, %v751_v40  ;;  %v761_v49 = vmul.f32 %v3995_v17, %v759_v45 }
  0x94   : > { %3202 = vmatmul.mubr.msk.bf16.vlgmr.msra.gmra.mrb[0].mxu1 %vm809_vm1, %v854_v39  ;;  %3208 = vmatpush3.bf16.msra.mxu0 %v3954_v6  ;;  %v746_v13 = vmax.f32 %v744_v43, 0.0  ;;  %v766_v15 = vmul.f32 %v4008_v19, %v765_v46  ;;  %v767_v50 = vmul.f32 %v4010_v20, %v765_v46  ;;  %v771_v16 = vstv %s4067_s17  ;;  %s4166_s17 = sld [smem:[#allocation4 + $0x1a]] }
  0x95   : > { %3218 = vmatpush3.bf16.msra.mxu1 %v3945_v4  ;;  %v747_v14 = vmax.f32 %v745_v44, 0.0  ;;  %3209 = vmatprep.subr.bf16.mxu0 %v3712_v5  ;;  %v762_v51 = vadd.f32 %v760_v12, %v756_v47  ;;  %v763_v52 = vadd.f32 %v761_v49, %v757_v48  ;;  %v990_v57 = vstv %s4138_s20  ;;  %s4176_s20 = sld [smem:[#allocation4 + $0x1f]] }
  0x96   : > { %3219 = vmatprep.subr.bf16.mxu1 %v3712_v5  ;;  %3225 = vmatprep.mubr.msk.bf16.mxu1 %vm3713_vm0, %v3712_v5  ;;  %v1018_v58 = vstv %s4140_s23  ;;  %v1046_v59 = vstv %s4142_s21  ;;  %v1074_v60 = vstv %s4144_s29  ;;  %v994_v62 = vstv %s4146_s2  ;;  %s4178_s23 = sld [smem:[#allocation7 + $0x4]]  ;;  %s4180_s21 = sld [smem:[#allocation7 + $0x5]] }
  0x97   : > { %v768_v17 = vadd.f32 %v766_v15, %v762_v51  ;;  %v769_v4 = vadd.f32 %v767_v50, %v763_v52  ;;  %v899_v53 = vpack.c.bf16 %v747_v14, %v746_v13  ;;  %v1022_v63 = vstv %s4148_s30  ;;  %s4182_s29 = sld [smem:[#allocation7 + $0x6]]  ;;  %s4184_s2 = sld [smem:[#allocation7 + $0x7]] }
  0x98   : > { %3210 = vmatpush3.bf16.msra.mxu0 %v3961_v7  ;;  %v1050_v0 = vstv %s4150_s19  ;;  %v1078_v1 = vstv %s4152_s22  ;;  %v1000_v45 = vstv %s4162_s0  ;;  %v1028_v46 = vstv %s4164_s16  ;;  %s4227_s22 = sld [smem:[#allocation4 + $0x20]]  ;;  %s4229_s0 = sld [smem:[#allocation4 + $0x24]] }
  0x99   : > { %3220 = vmatpush3.bf16.msra.mxu1 %v3954_v6  ;;  %3211 = vmatprep.subr.bf16.mxu0 %v3712_v5  ;;  %v772_v19 = vadd.f32 %v771_v16, %v768_v17  ;;  %v773_v20 = vadd.f32 %v771_v16, %v769_v4  ;;  %v1084_v48 = vstv %s4168_s1  ;;  %v1006_v49 = vstv %s4170_s3  ;;  %s4231_s16 = sld [smem:[#allocation4 + $0x28]]  ;;  %s4235_s1 = sld [smem:[#allocation4 + $0x21]] }
  0x9a   : > { %3221 = vmatprep.subr.bf16.mxu1 %v3712_v5  ;;  %v1056_v47 = vstv %s4166_s17  ;;  %v1034_v13 = vstv %s4172_s11  ;;  %v1062_v14 = vstv %s4174_s27  ;;  %s4233_s17 = sld [smem:[#allocation4 + $0x2c]]  ;;  %s4237_s3 = sld [smem:[#allocation4 + $0x25]] }
  0x9b   : > { %v774_v54 = vmax.f32 %v772_v19, 0.0  ;;  %v775_v55 = vmax.f32 %v773_v20, 0.0  ;;  %v1090_v15 = vstv %s4176_s20  ;;  %s4239_s11 = sld [smem:[#allocation4 + $0x29]]  ;;  %s4241_s27 = sld [smem:[#allocation4 + $0x2d]] }
  0x9c   : > { %3212 = vmatpush3.bf16.msra.mxu0 %v4004_v18  ;;  %v1012_v4 = vstv %s4178_s23  ;;  %v1040_v19 = vstv %s4180_s21  ;;  %s4243_s20 = sld [smem:[#allocation4 + $0x22]]  ;;  %s4245_s23 = sld [smem:[#allocation4 + $0x26]] }
  0x9d   : > { %3222 = vmatpush3.bf16.msra.mxu1 %v3961_v7  ;;  %3229 = vmatprep.subr.bf16.mxu0 %v3712_v5  ;;  %v944_v6 = vpack.c.bf16 %v775_v55, %v774_v54  ;;  %v4123_v7 = vld [vmem:[%s4757_s4] sm:$0xff]   ;;  %v1068_v20 = vstv %s4182_s29  ;;  %s4247_s21 = sld [smem:[#allocation4 + $0x2a]]  ;;  %s4249_s29 = sld [smem:[#allocation4 + $0x2e]] }
  0x9e   : > { %3223 = vmatprep.subr.bf16.mxu1 %v3712_v5  ;;  %s4253_s30 = sld [smem:[#allocation4 + $0x27]]  ;;  %s4259_s19 = sld [smem:[#allocation4 + $0x2b]] }
  0x9f   : > { %3214 = vmatmul.mubr.msk.bf16.vlgmr.msra.gmra.mrb[4].mxu0 %vm809_vm1, %v899_v53  ;;  %v1096_v53 = vstv %s4184_s2  ;;  %s4251_s2 = sld [smem:[#allocation4 + $0x23]] }
  0xa0   : > { %3233 = vmatprep.mubr.msk.bf16.mxu0 %vm3713_vm0, %v3712_v5  ;;  %3230 = vmatpush3.bf16.msra.mxu0 %v4123_v7 }
  0xa1   : > { %3224 = vmatpush3.bf16.msra.mxu1 %v4004_v18  ;;  %3231 = vmatprep.subr.bf16.mxu0 %v3712_v5  ;;  %v4131_v18 = vld [vmem:[%s4757_s4 + $0x8] sm:$0xff]   ;;  %s4261_s4 = sld [smem:[#allocation4 + $0x2f]] }
  0xa2   : > { %3237 = vmatprep.subr.bf16.mxu1 %v3712_v5 }
  0xa4   : > { %3226 = vmatmul.mubr.msk.bf16.vlgmr.msra.gmra.mrb[4].mxu1 %vm809_vm1, %v944_v6  ;;  %3232 = vmatpush3.bf16.msra.mxu0 %v4131_v18 }
  0xa5   : > { %3241 = vmatprep.mubr.msk.bf16.mxu1 %vm3713_vm0, %v3712_v5  ;;  %3238 = vmatpush3.bf16.msra.mxu1 %v4123_v7 }
  0xa6   : > { %3239 = vmatprep.subr.bf16.mxu1 %v3712_v5  ;;  %3245 = vmatprep.subr.bf16.mxu0 %v3712_v5 }
  0xa9   : > { %3240 = vmatpush3.bf16.msra.mxu1 %v4131_v18 }
  0xaa   : > { %3253 = vmatprep.subr.bf16.mxu1 %v3712_v5 }
 0x162   : > { %v847_v56 = vpop.f32.mrb[0].mxu0 }
 0x163   : > { %v3191_v61 = vpop.f32.mrb[1].mxu0  ;;  %v991_v3 = vmul.f32 %v990_v57, %v847_v56  ;;  %v1019_v8 = vmul.f32 %v1018_v58, %v847_v56  ;;  %v1047_v9 = vmul.f32 %v1046_v59, %v847_v56  ;;  %v1075_v10 = vmul.f32 %v1074_v60, %v847_v56 }
 0x164   : > { %v850_v2 = vpop.f32.mrb[2].mxu0 }
 0x165   : > { %v3192_v11 = vpop.f32.mrb[3].mxu0  ;;  %v992_v27 = vmul.f32 %v990_v57, %v850_v2  ;;  %v1020_v28 = vmul.f32 %v1018_v58, %v850_v2  ;;  %v1048_v29 = vmul.f32 %v1046_v59, %v850_v2  ;;  %v1076_v30 = vmul.f32 %v1074_v60, %v850_v2 }
 0x167   : > { %v892_v21 = vpop.f32.mrb[0].mxu1 }
 0x168   : > { %v995_v22 = vmul.f32 %v994_v62, %v892_v21  ;;  %v1023_v23 = vmul.f32 %v1022_v63, %v892_v21  ;;  %v1051_v24 = vmul.f32 %v1050_v0, %v892_v21  ;;  %v1079_v25 = vmul.f32 %v1078_v1, %v892_v21  ;;  %v3203_v26 = vpop.f32.mrb[1].mxu1 }
 0x169   : > { %v895_v31 = vpop.f32.mrb[2].mxu1 }
 0x16a   : > { %v997_v32 = vadd.f32 %v995_v22, %v991_v3  ;;  %v1025_v33 = vadd.f32 %v1023_v23, %v1019_v8  ;;  %v1053_v34 = vadd.f32 %v1051_v24, %v1047_v9  ;;  %v1081_v35 = vadd.f32 %v1079_v25, %v1075_v10  ;;  %v3204_v36 = vpop.f32.mrb[3].mxu1 }
 0x16b   : > { %v996_v37 = vmul.f32 %v994_v62, %v895_v31  ;;  %v1024_v38 = vmul.f32 %v1022_v63, %v895_v31  ;;  %v1052_v39 = vmul.f32 %v1050_v0, %v895_v31  ;;  %v1080_v40 = vmul.f32 %v1078_v1, %v895_v31 }
 0x16d   : > { %v998_v41 = vadd.f32 %v996_v37, %v992_v27  ;;  %v1026_v42 = vadd.f32 %v1024_v38, %v1020_v28  ;;  %v1054_v43 = vadd.f32 %v1052_v39, %v1048_v29  ;;  %v1082_v44 = vadd.f32 %v1080_v40, %v1076_v30 }
 0x172   : > { %v937_v12 = vpop.f32.mrb[4].mxu0 }
 0x173   : > { %v1001_v50 = vmul.f32 %v1000_v45, %v937_v12  ;;  %v1029_v51 = vmul.f32 %v1028_v46, %v937_v12  ;;  %v1057_v52 = vmul.f32 %v1056_v47, %v937_v12  ;;  %v1085_v16 = vmul.f32 %v1084_v48, %v937_v12  ;;  %v3215_v17 = vpop.f32.mrb[5].mxu0 }
 0x174   : > { %v940_v54 = vpop.f32.mrb[6].mxu0  ;;  %v1383_v17 = vstv %s4233_s17  ;;  %s4325_s17 = sld [smem:[#allocation4 + $0x30]] }
 0x175   : > { %v1003_v55 = vadd.f32 %v1001_v50, %v997_v32  ;;  %v1031_v6 = vadd.f32 %v1029_v51, %v1025_v33  ;;  %v1059_v56 = vadd.f32 %v1057_v52, %v1053_v34  ;;  %v1087_v57 = vadd.f32 %v1085_v16, %v1081_v35  ;;  %v3216_v58 = vpop.f32.mrb[7].mxu0 }
 0x176   : > { %v1002_v60 = vmul.f32 %v1000_v45, %v940_v54  ;;  %v1030_v61 = vmul.f32 %v1028_v46, %v940_v54  ;;  %v1058_v62 = vmul.f32 %v1056_v47, %v940_v54  ;;  %v1086_v63 = vmul.f32 %v1084_v48, %v940_v54 }
 0x177   : > { %v982_v59 = vpop.f32.mrb[4].mxu1  ;;  %v1327_v52 = vstv %s4229_s0  ;;  %v1355_v16 = vstv %s4231_s16  ;;  %v1393_v58 = vstv %s4249_s29  ;;  %s4277_s0 = sld [smem:[#allocation7 + $0xb]]  ;;  %s4339_s29 = sld [smem:[#allocation4 + $0x3d]] }
 0x178   : > { %v1007_v0 = vmul.f32 %v1006_v49, %v982_v59  ;;  %v1035_v1 = vmul.f32 %v1034_v13, %v982_v59  ;;  %v1063_v2 = vmul.f32 %v1062_v14, %v982_v59  ;;  %v1091_v3 = vmul.f32 %v1090_v15, %v982_v59  ;;  %v3227_v8 = vpop.f32.mrb[5].mxu1  ;;  %s4363_s16 = sld [smem:[#allocation4 + $0x3b]] }
 0x179   : > { %v1004_v9 = vadd.f32 %v1002_v60, %v998_v41  ;;  %v1032_v10 = vadd.f32 %v1030_v61, %v1026_v42  ;;  %v1060_v11 = vadd.f32 %v1058_v62, %v1054_v43  ;;  %v1088_v21 = vadd.f32 %v1086_v63, %v1082_v44  ;;  %v985_v22 = vpop.f32.mrb[6].mxu1 }
 0x17a   : > { %v1009_v23 = vadd.f32 %v1007_v0, %v1003_v55  ;;  %v1037_v24 = vadd.f32 %v1035_v1, %v1031_v6  ;;  %v1065_v25 = vadd.f32 %v1063_v2, %v1059_v56  ;;  %v1093_v26 = vadd.f32 %v1091_v3, %v1087_v57  ;;  %v3228_v27 = vpop.f32.mrb[7].mxu1 }
 0x17b   : > { %v1008_v28 = vmul.f32 %v1006_v49, %v985_v22  ;;  %v1036_v29 = vmul.f32 %v1034_v13, %v985_v22  ;;  %v1064_v30 = vmul.f32 %v1062_v14, %v985_v22  ;;  %v1092_v31 = vmul.f32 %v1090_v15, %v985_v22 }
 0x17c   : > { %v1013_v32 = vadd.f32 %v1012_v4, %v1009_v23  ;;  %v1041_v33 = vadd.f32 %v1040_v19, %v1037_v24  ;;  %v1069_v34 = vadd.f32 %v1068_v20, %v1065_v25  ;;  %v1097_v35 = vadd.f32 %v1096_v53, %v1093_v26 }
 0x17d   : > { %v1010_v36 = vadd.f32 %v1008_v28, %v1004_v9  ;;  %v1038_v37 = vadd.f32 %v1036_v29, %v1032_v10  ;;  %v1066_v38 = vadd.f32 %v1064_v30, %v1060_v11  ;;  %v1094_v39 = vadd.f32 %v1092_v31, %v1088_v21 }
 0x17e   : > { %v1015_v44 = vmax.f32 %v1013_v32, 0.0  ;;  %v1043_v45 = vmax.f32 %v1041_v33, 0.0  ;;  %v1071_v46 = vmax.f32 %v1069_v34, 0.0  ;;  %v1099_v47 = vmax.f32 %v1097_v35, 0.0 }
 0x17f   : > { %v1014_v40 = vadd.f32 %v1012_v4, %v1010_v36  ;;  %v1042_v41 = vadd.f32 %v1040_v19, %v1038_v37  ;;  %v1070_v42 = vadd.f32 %v1068_v20, %v1066_v38  ;;  %v1098_v43 = vadd.f32 %v1096_v53, %v1094_v39 }
 0x180   : > { %v1303_v4 = vstv %s4235_s1  ;;  %v1331_v19 = vstv %s4237_s3  ;;  %v1359_v20 = vstv %s4239_s11  ;;  %v1387_v53 = vstv %s4241_s27  ;;  %s4327_s1 = sld [smem:[#allocation4 + $0x34]]  ;;  %s4329_s3 = sld [smem:[#allocation4 + $0x38]] }
 0x181   : > { %v1016_v48 = vmax.f32 %v1014_v40, 0.0  ;;  %v1044_v12 = vmax.f32 %v1042_v41, 0.0  ;;  %v1072_v49 = vmax.f32 %v1070_v42, 0.0  ;;  %v1100_v13 = vmax.f32 %v1098_v43, 0.0  ;;  %s4331_s11 = sld [smem:[#allocation4 + $0x3c]]  ;;  %s2513_s27 = sld [smem:[#allocation10]] }
 0x182   : > { %v1309_v6 = vstv %s4243_s20  ;;  %v1337_v56 = vstv %s4245_s23  ;;  %v1365_v57 = vstv %s4247_s21  ;;  %v1315_v34 = vstv %s4251_s2  ;;  %s4333_s20 = sld [smem:[#allocation4 + $0x31]]  ;;  %s4335_s23 = sld [smem:[#allocation4 + $0x35]] }
 0x183   : > { %v1105_v14 = vpack.c.bf16 %v1016_v48, %v1015_v44  ;;  %v1163_v15 = vpack.c.bf16 %v1044_v12, %v1043_v45  ;;  %v1208_v50 = vpack.c.bf16 %v1072_v49, %v1071_v46  ;;  %v1253_v51 = vpack.c.bf16 %v1100_v13, %v1099_v47  ;;  %s4337_s21 = sld [smem:[#allocation4 + $0x39]] }
 0x184   : > { %v1343_v35 = vstv %s4253_s30  ;;  %v1371_v36 = vstv %s4259_s19  ;;  %v1399_v37 = vstv %s4261_s4  ;;  %v1349_v45 = vstv %s4269_s12  ;;  %s3052_s2 = sld [smem:[#allocation10 + $0x1]]  ;;  %s4341_s30 = sld [smem:[#allocation4 + $0x32]] }
 0x185   : > { %3234 = vmatmul.mubr.msk.bf16.vlgmr.msra.gmra.mrb[8].mxu0 %vm1118_vm2, %v1105_v14  ;;  %3242 = vmatmul.mubr.msk.bf16.vlgmr.msra.gmra.mrb[8].mxu1 %vm1118_vm2, %v1163_v15  ;;  %v1405_v47 = vstv %s4277_s0  ;;  %s4343_s19 = sld [smem:[#allocation4 + $0x36]]  ;;  %s3053_s4 = sld [smem:[#allocation10 + $0x2]] }
 0x186   : > { %3246 = vmatpush3.bf16.msra.mxu0 %v4123_v7  ;;  %3254 = vmatpush3.bf16.msra.mxu1 %v4123_v7  ;;  %v4221_v7 = vld [vmem:[%s4758_s5] sm:$0xff]   ;;  %s4267_s5 = sld [smem:[#allocation7 + $0x8]]  ;;  %s4347_s0 = sld [smem:[#allocation4 + $0x3e]] }
 0x187   : > { %3247 = vmatprep.subr.bf16.mxu0 %v3712_v5  ;;  %3255 = vmatprep.subr.bf16.mxu1 %v3712_v5  ;;  %s4351_s12 = sld [smem:[#allocation4 + $0x37]] }
 0x188   : > { %3249 = vmatprep.mubr.msk.bf16.mxu0 %vm3713_vm0, %v3712_v5  ;;  %3257 = vmatprep.mubr.msk.bf16.mxu1 %vm3713_vm0, %v3712_v5 }
 0x18a   : > { %3248 = vmatpush3.bf16.msra.mxu0 %v4131_v18  ;;  %3256 = vmatpush3.bf16.msra.mxu1 %v4131_v18  ;;  %v1299_v18 = vstv %s4227_s22  ;;  %s4275_s22 = sld [smem:[#allocation7 + $0xa]] }
 0x18b   : > { %3261 = vmatprep.subr.bf16.mxu0 %v3712_v5  ;;  %3267 = vmatprep.subr.bf16.mxu1 %v3712_v5 }
 0x18c   : > { %v1321_v44 = vstv %s4267_s5  ;;  %s4349_s5 = sld [smem:[#allocation4 + $0x33]] }
 0x18d   : > { %3250 = vmatmul.mubr.msk.bf16.vlgmr.msra.gmra.mrb[12].mxu0 %vm1118_vm2, %v1208_v50  ;;  %3258 = vmatmul.mubr.msk.bf16.vlgmr.msra.gmra.mrb[12].mxu1 %vm1118_vm2, %v1253_v51 }
 0x18e   : > { %3263 = vmatprep.mubr.msk.bf16.mxu0 %vm3713_vm0, %v3712_v5  ;;  %3269 = vmatprep.mubr.msk.bf16.mxu1 %vm3713_vm0, %v3712_v5 }
 0x18f   : > { %3262 = vmatpush3.bf16.msra.mxu0 %v4221_v7  ;;  %3268 = vmatpush3.bf16.msra.mxu1 %v4221_v7 }
 0x190   : > { %3273 = vmatprep.subr.bf16.mxu0 %v3712_v5  ;;  %3279 = vmatprep.subr.bf16.mxu1 %v3712_v5  ;;  %v1377_v46 = vstv %s4275_s22  ;;  %s4345_s22 = sld [smem:[#allocation4 + $0x3a]] }
 0x258   : > { %v1156_v54 = vpop.f32.mrb[8].mxu0  ;;  %v1201_v55 = vpop.f32.mrb[8].mxu1 }
 0x259   : > { %v1300_v59 = vmul.f32 %v1299_v18, %v1156_v54  ;;  %v1328_v60 = vmul.f32 %v1327_v52, %v1156_v54  ;;  %v1356_v61 = vmul.f32 %v1355_v16, %v1156_v54  ;;  %v1384_v62 = vmul.f32 %v1383_v17, %v1156_v54  ;;  %v3235_v63 = vpop.f32.mrb[9].mxu0  ;;  %v3243_v0 = vpop.f32.mrb[9].mxu1 }
 0x25a   : > { %v1304_v1 = vmul.f32 %v1303_v4, %v1201_v55  ;;  %v1332_v2 = vmul.f32 %v1331_v19, %v1201_v55  ;;  %v1360_v3 = vmul.f32 %v1359_v20, %v1201_v55  ;;  %v1388_v8 = vmul.f32 %v1387_v53, %v1201_v55  ;;  %v1159_v9 = vpop.f32.mrb[10].mxu0  ;;  %v1204_v10 = vpop.f32.mrb[10].mxu1 }
 0x25b   : > { %v1301_v11 = vmul.f32 %v1299_v18, %v1159_v9  ;;  %v1329_v21 = vmul.f32 %v1327_v52, %v1159_v9  ;;  %v1357_v22 = vmul.f32 %v1355_v16, %v1159_v9  ;;  %v1385_v23 = vmul.f32 %v1383_v17, %v1159_v9  ;;  %v3236_v24 = vpop.f32.mrb[11].mxu0  ;;  %v3244_v25 = vpop.f32.mrb[11].mxu1 }
 0x25c   : > { %v1306_v26 = vadd.f32 %v1304_v1, %v1300_v59  ;;  %v1334_v27 = vadd.f32 %v1332_v2, %v1328_v60  ;;  %v1362_v28 = vadd.f32 %v1360_v3, %v1356_v61  ;;  %v1390_v29 = vadd.f32 %v1388_v8, %v1384_v62 }
 0x25d   : > { %v1305_v30 = vmul.f32 %v1303_v4, %v1204_v10  ;;  %v1333_v31 = vmul.f32 %v1331_v19, %v1204_v10  ;;  %v1361_v32 = vmul.f32 %v1359_v20, %v1204_v10  ;;  %v1389_v33 = vmul.f32 %v1387_v53, %v1204_v10 }
 0x25f   : > { %v1307_v38 = vadd.f32 %v1305_v30, %v1301_v11  ;;  %v1335_v39 = vadd.f32 %v1333_v31, %v1329_v21  ;;  %v1363_v40 = vadd.f32 %v1361_v32, %v1357_v22  ;;  %v1391_v41 = vadd.f32 %v1389_v33, %v1385_v23 }
 0x260   : > { %v1246_v42 = vpop.f32.mrb[12].mxu0  ;;  %v1291_v43 = vpop.f32.mrb[12].mxu1 }
 0x261   : > { %v1310_v48 = vmul.f32 %v1309_v6, %v1246_v42  ;;  %v1338_v12 = vmul.f32 %v1337_v56, %v1246_v42  ;;  %v1366_v49 = vmul.f32 %v1365_v57, %v1246_v42  ;;  %v1394_v13 = vmul.f32 %v1393_v58, %v1246_v42  ;;  %v3251_v14 = vpop.f32.mrb[13].mxu0  ;;  %v3259_v15 = vpop.f32.mrb[13].mxu1 }
 0x262   : > { %v1316_v50 = vmul.f32 %v1315_v34, %v1291_v43  ;;  %v1344_v51 = vmul.f32 %v1343_v35, %v1291_v43  ;;  %v1372_v18 = vmul.f32 %v1371_v36, %v1291_v43  ;;  %v1400_v52 = vmul.f32 %v1399_v37, %v1291_v43  ;;  %v1249_v16 = vpop.f32.mrb[14].mxu0  ;;  %v1294_v17 = vpop.f32.mrb[14].mxu1 }
 0x263   : > { %v1312_v4 = vadd.f32 %v1310_v48, %v1306_v26  ;;  %v1340_v19 = vadd.f32 %v1338_v12, %v1334_v27  ;;  %v1368_v20 = vadd.f32 %v1366_v49, %v1362_v28  ;;  %v1396_v53 = vadd.f32 %v1394_v13, %v1390_v29  ;;  %v3252_v54 = vpop.f32.mrb[15].mxu0  ;;  %v3260_v55 = vpop.f32.mrb[15].mxu1 }
 0x264   : > { %v1311_v59 = vmul.f32 %v1309_v6, %v1249_v16  ;;  %v1339_v60 = vmul.f32 %v1337_v56, %v1249_v16  ;;  %v1367_v61 = vmul.f32 %v1365_v57, %v1249_v16  ;;  %v1395_v62 = vmul.f32 %v1393_v58, %v1249_v16 }
 0x265   : > { %v1318_v63 = vadd.f32 %v1316_v50, %v1312_v4  ;;  %v1346_v0 = vadd.f32 %v1344_v51, %v1340_v19  ;;  %v1374_v1 = vadd.f32 %v1372_v18, %v1368_v20  ;;  %v1402_v2 = vadd.f32 %v1400_v52, %v1396_v53 }
 0x266   : > { %v1313_v3 = vadd.f32 %v1311_v59, %v1307_v38  ;;  %v1341_v8 = vadd.f32 %v1339_v60, %v1335_v39  ;;  %v1369_v9 = vadd.f32 %v1367_v61, %v1363_v40  ;;  %v1397_v10 = vadd.f32 %v1395_v62, %v1391_v41 }
 0x267   : > { %v1317_v11 = vmul.f32 %v1315_v34, %v1294_v17  ;;  %v1345_v21 = vmul.f32 %v1343_v35, %v1294_v17  ;;  %v1373_v22 = vmul.f32 %v1371_v36, %v1294_v17  ;;  %v1401_v23 = vmul.f32 %v1399_v37, %v1294_v17 }
 0x268   : > { %v1322_v24 = vadd.f32 %v1321_v44, %v1318_v63  ;;  %v1350_v6 = vadd.f32 %v1349_v45, %v1346_v0  ;;  %v1378_v25 = vadd.f32 %v1377_v46, %v1374_v1  ;;  %v1406_v56 = vadd.f32 %v1405_v47, %v1402_v2 }
 0x269   : > { %v1319_v26 = vadd.f32 %v1317_v11, %v1313_v3  ;;  %v1347_v57 = vadd.f32 %v1345_v21, %v1341_v8  ;;  %v1375_v27 = vadd.f32 %v1373_v22, %v1369_v9  ;;  %v1403_v58 = vadd.f32 %v1401_v23, %v1397_v10 }
 0x26a   : > { %v1324_v32 = vmax.f32 %v1322_v24, 0.0  ;;  %v1352_v33 = vmax.f32 %v1350_v6, 0.0  ;;  %v1380_v38 = vmax.f32 %v1378_v25, 0.0  ;;  %v1408_v39 = vmax.f32 %v1406_v56, 0.0 }
 0x26b   : > { %v1323_v28 = vadd.f32 %v1321_v44, %v1319_v26  ;;  %v1351_v29 = vadd.f32 %v1349_v45, %v1347_v57  ;;  %v1379_v30 = vadd.f32 %v1377_v46, %v1375_v27  ;;  %v1407_v31 = vadd.f32 %v1405_v47, %v1403_v58  ;;  %v1712_v44 = vld [vmem:[%s4706_s6] sm:$0xf] }
 0x26c   : > { %v1769_v46 = vsel %vm1720_vm4, %v1712_v44, 0  ;;  %v1600_v47 = vstv %s4325_s17  ;;  %v1628_v48 = vstv %s4327_s1  ;;  %v1656_v12 = vstv %s4329_s3  ;;  %s4370_s17 = sld [smem:[#allocation4 + $0x3f]]  ;;  %s4372_s1 = sld [smem:[#allocation10 + $0x3]] }
 0x26d   : > { %v1325_v34 = vmax.f32 %v1323_v28, 0.0  ;;  %v1353_v35 = vmax.f32 %v1351_v29, 0.0  ;;  %v1381_v36 = vmax.f32 %v1379_v30, 0.0  ;;  %v1409_v37 = vmax.f32 %v1407_v31, 0.0  ;;  %s4383_s3 = sld [smem:[#allocation7 + $0xc]] }
 0x26e   : > { %v1684_v49 = vstv %s4331_s11  ;;  %v4357_v13 = vstv %s2513_s27  ;;  %v1604_v14 = vstv %s4333_s20  ;;  %v1632_v15 = vstv %s4335_s23  ;;  %s4390_s11 = sld [smem:[#allocation7 + $0xd]]  ;;  %s4398_s27 = sld [smem:[#allocation7 + $0xe]] }
 0x26f   : > { %v1412_v40 = vpack.c.bf16 %v1325_v34, %v1324_v32  ;;  %v1464_v41 = vpack.c.bf16 %v1353_v35, %v1352_v33  ;;  %v1509_v42 = vpack.c.bf16 %v1381_v36, %v1380_v38  ;;  %v1554_v43 = vpack.c.bf16 %v1409_v37, %v1408_v39  ;;  %s4400_s20 = sld [smem:[#allocation7 + $0xf]]  ;;  %s2050_s23 = sld [smem:[#allocation9]] }
 0x270   : > { %v1660_v50 = vstv %s4337_s21  ;;  %v1688_v51 = vstv %s4339_s29  ;;  %v4365_v18 = vstv %s3052_s2  ;;  %v1610_v52 = vstv %s4341_s30  ;;  %s2987_s21 = sld [smem:[#allocation9 + $0x1]]  ;;  %s3014_s29 = sld [smem:[#allocation9 + $0x2]] }
 0x271   : > { %3264 = vmatmul.mubr.msk.bf16.vlgmr.msra.gmra.mrb[16].mxu0 %vm1419_vm3, %v1412_v40  ;;  %3270 = vmatmul.mubr.msk.bf16.vlgmr.msra.gmra.mrb[16].mxu1 %vm1419_vm3, %v1464_v41  ;;  %v1638_v16 = vstv %s4343_s19  ;;  %v1666_v17 = vstv %s4345_s22  ;;  %v1694_v20 = vstv %s4347_s0  ;;  %v4375_v53 = vstv %s3053_s4  ;;  %s3041_s2 = sld [smem:[#allocation9 + $0x3]]  ;;  %s2675_s30 = sld [smem:[#allocation2]] }
 0x272   : > { %3274 = vmatpush3.bf16.msra.mxu0 %v4221_v7  ;;  %3280 = vmatpush3.bf16.msra.mxu1 %v4221_v7  ;;  %v2943_v7 = vld [vmem:[%s4706_s6 + $0x4] sm:$0xf]  ;;  %v1616_v54 = vstv %s4349_s5  ;;  %v1644_v55 = vstv %s4351_s12  ;;  %v1672_v39 = vstv %s4363_s16  ;;  %s2839_s19 = sshll.u32 %s3927_s28, 1  ;;  %s3062_s22 = sshll.u32 %s3824_s13, 5 }
 0x273   : > { %3275 = vmatprep.mubr.msk.bf16.mxu0 %vm3713_vm0, %v3712_v5  ;;  %3281 = vmatprep.mubr.msk.bf16.mxu1 %vm3713_vm0, %v3712_v5  ;;  %v1722_v45 = vsel %vm1720_vm4, %v2943_v7, 0  ;;  %v1700_v34 = vstv %s4370_s17  ;;  %v4388_v35 = vstv %s4372_s1  ;;  %s642_s0 = scalar_lea.vmem [#allocation12], %s2839_s19  ;;  %s4759_s16 = sld [smem:[#allocation29_spill]] }
 0x274   : > { %3285 = vmatprep.subr.bf16.mxu0 %v3712_v5  ;;  %3291 = vmatprep.subr.bf16.mxu1 %v3712_v5  ;;  %s2717_s4 = sshll.u32 %s642_s0, 4  ;;  %s2704_s1 = scalar_lea.sflag [#allocation5], %s3927_s28  ;;  %s4658_s4 = int_to_ptr.vmem [resolvable:$true] %s2717_s4 }
 0x275   : > { %s3632_s13 = scalar_lea.vmem %s4658_s4, 32 }
 0x276   : > { %p3633_p13 = scmp.ne.s32.totalorder %s4658_s4, %s3632_s13 }
 0x278   : > { %p3634_p3 = pnand %p3633_p13, %p4760_p1 }
 0x279   : > { %3276 = vmatmul.mubr.msk.bf16.vlgmr.msra.gmra.mrb[20].mxu0 %vm1419_vm3, %v1509_v42  ;;  %3282 = vmatmul.mubr.msk.bf16.vlgmr.msra.gmra.mrb[20].mxu1 %vm1419_vm3, %v1554_v43  ;;  %vm2698_vm3 = vcmask 1041409   ;;  %s4656_s17 = scalar_lea.hbm %s4759_s16, %s3062_s22 }
 0x27a   : > { %3287 = vmatprep.mubr.msk.bf16.mxu0 %vm3713_vm0, %v3712_v5  ;;  %3293 = vmatprep.mubr.msk.bf16.mxu1 %vm3713_vm0, %v3712_v5  ;;  %p3635_p4 = pneg %p3634_p3 }
 0x27b   : > { %3286 = vmatpush3.bf16.msra.mxu0 %v1722_v45  ;;  %3292 = vmatpush3.bf16.msra.mxu1 %v1769_v46 }
 0x27c   : > { %3297 = vmatprep.subr.bf16.mxu0 %v3712_v5  ;;  %3303 = vmatprep.subr.bf16.mxu1 %v3712_v5 }
 0x344   : > { %v1457_v4 = vpop.f32.mrb[16].mxu0  ;;  %v1502_v19 = vpop.f32.mrb[16].mxu1 }
 0x345   : > { %v1601_v59 = vmul.f32 %v1600_v47, %v1457_v4  ;;  %v1629_v60 = vmul.f32 %v1628_v48, %v1457_v4  ;;  %v1657_v61 = vmul.f32 %v1656_v12, %v1457_v4  ;;  %v1685_v62 = vmul.f32 %v1684_v49, %v1457_v4  ;;  %v3265_v63 = vpop.f32.mrb[17].mxu0  ;;  %v3271_v0 = vpop.f32.mrb[17].mxu1 }
 0x346   : > { %v2515_v1 = vmul.f32 %v4357_v13, %v1457_v4  ;;  %v1605_v2 = vmul.f32 %v1604_v14, %v1502_v19  ;;  %v1633_v3 = vmul.f32 %v1632_v15, %v1502_v19  ;;  %v1661_v8 = vmul.f32 %v1660_v50, %v1502_v19  ;;  %v1460_v9 = vpop.f32.mrb[18].mxu0  ;;  %v1505_v10 = vpop.f32.mrb[18].mxu1 }
 0x347   : > { %v1689_v11 = vmul.f32 %v1688_v51, %v1502_v19  ;;  %v2521_v21 = vmul.f32 %v4365_v18, %v1502_v19  ;;  %v1602_v22 = vmul.f32 %v1600_v47, %v1460_v9  ;;  %v1630_v23 = vmul.f32 %v1628_v48, %v1460_v9  ;;  %v3266_v24 = vpop.f32.mrb[19].mxu0  ;;  %v3272_v6 = vpop.f32.mrb[19].mxu1 }
 0x348   : > { %v1607_v25 = vadd.f32 %v1605_v2, %v1601_v59  ;;  %v1635_v56 = vadd.f32 %v1633_v3, %v1629_v60  ;;  %v1663_v26 = vadd.f32 %v1661_v8, %v1657_v61  ;;  %v1658_v57 = vmul.f32 %v1656_v12, %v1460_v9 }
 0x349   : > { %v1691_v27 = vadd.f32 %v1689_v11, %v1685_v62  ;;  %v2523_v58 = vadd.f32 %v2521_v21, %v2515_v1  ;;  %v1686_v28 = vmul.f32 %v1684_v49, %v1460_v9  ;;  %v2516_v29 = vmul.f32 %v4357_v13, %v1460_v9 }
 0x34a   : > { %v1606_v30 = vmul.f32 %v1604_v14, %v1505_v10  ;;  %v1634_v31 = vmul.f32 %v1632_v15, %v1505_v10  ;;  %v1662_v32 = vmul.f32 %v1660_v50, %v1505_v10  ;;  %v1690_v33 = vmul.f32 %v1688_v51, %v1505_v10 }
 0x34b   : > { %v2522_v38 = vmul.f32 %v4365_v18, %v1505_v10  ;;  %v1622_v24 = vstv %s4383_s3  ;;  %s3714_s3 = smov [#allocation12]  }
 0x34c   : > { %v1608_v36 = vadd.f32 %v1606_v30, %v1602_v22  ;;  %v1636_v37 = vadd.f32 %v1634_v31, %v1630_v23  ;;  %v1664_v40 = vadd.f32 %v1662_v32, %v1658_v57  ;;  %v1692_v41 = vadd.f32 %v1690_v33, %v1686_v28  ;;  %v1547_v42 = vpop.f32.mrb[20].mxu0  ;;  %v1592_v43 = vpop.f32.mrb[20].mxu1 }
 0x34d   : > { %v2524_v7 = vadd.f32 %v2522_v38, %v2516_v29  ;;  %v1611_v44 = vmul.f32 %v1610_v52, %v1547_v42  ;;  %v1639_v45 = vmul.f32 %v1638_v16, %v1547_v42  ;;  %v1667_v46 = vmul.f32 %v1666_v17, %v1547_v42  ;;  %v3277_v47 = vpop.f32.mrb[21].mxu0  ;;  %v3283_v48 = vpop.f32.mrb[21].mxu1 }
 0x34e   : > { %v1695_v12 = vmul.f32 %v1694_v20, %v1547_v42  ;;  %v2531_v49 = vmul.f32 %v4375_v53, %v1547_v42  ;;  %v1617_v14 = vmul.f32 %v1616_v54, %v1592_v43  ;;  %v1645_v15 = vmul.f32 %v1644_v55, %v1592_v43  ;;  %v1550_v50 = vpop.f32.mrb[22].mxu0  ;;  %v1595_v51 = vpop.f32.mrb[22].mxu1 }
 0x34f   : > { %v1613_v4 = vadd.f32 %v1611_v44, %v1607_v25  ;;  %v1641_v19 = vadd.f32 %v1639_v45, %v1635_v56  ;;  %v1669_v59 = vadd.f32 %v1667_v46, %v1663_v26  ;;  %v1673_v60 = vmul.f32 %v1672_v39, %v1592_v43  ;;  %v3278_v61 = vpop.f32.mrb[23].mxu0  ;;  %v3284_v62 = vpop.f32.mrb[23].mxu1 }
 0x350   : > { %v1697_v63 = vadd.f32 %v1695_v12, %v1691_v27  ;;  %v2533_v0 = vadd.f32 %v2531_v49, %v2523_v58  ;;  %v1701_v1 = vmul.f32 %v1700_v34, %v1592_v43  ;;  %v2541_v2 = vmul.f32 %v4388_v35, %v1592_v43  ;;  %v3508_v62 = vld [vmem:[%s4708_s8] sm:$0xff]  }
 0x351   : > { %v1619_v3 = vadd.f32 %v1617_v14, %v1613_v4  ;;  %v1647_v8 = vadd.f32 %v1645_v15, %v1641_v19  ;;  %v1675_v9 = vadd.f32 %v1673_v60, %v1669_v59  ;;  %v1612_v10 = vmul.f32 %v1610_v52, %v1550_v50 }
 0x352   : > { %v1703_v11 = vadd.f32 %v1701_v1, %v1697_v63  ;;  %v4412_v21 = vadd.f32 %v2541_v2, %v2533_v0  ;;  %v1640_v22 = vmul.f32 %v1638_v16, %v1550_v50  ;;  %v1668_v23 = vmul.f32 %v1666_v17, %v1550_v50  ;;  %v3509_v63 = vld [vmem:[%s4708_s8 + $0x8] sm:$0xff]   ;;  %v3510_v0 = vld [vmem:[%s4708_s8 + $0x10] sm:$0xff]   ;;  %v3511_v1 = vld [vmem:[%s4708_s8 + $0x18] sm:$0xff]  }
 0x353   : > { %v1614_v6 = vadd.f32 %v1612_v10, %v1608_v36  ;;  %v1696_v26 = vmul.f32 %v1694_v20, %v1550_v50  ;;  %v1650_v57 = vstv %s4390_s11  ;;  %v1678_v27 = vstv %s4398_s27  ;;  %v3512_v2 = vld [vmem:[%s4710_s10] sm:$0xff]   ;;  %s3636_s11 = sshll.u32 %s3714_s3, 4  ;;  %s3637_s11 = int_to_ptr.vmem [resolvable:$false] %s3636_s11 }
 0x354   : > { %v1642_v25 = vadd.f32 %v1640_v22, %v1636_v37  ;;  %v1670_v56 = vadd.f32 %v1668_v23, %v1664_v40  ;;  %v1706_v58 = vstv %s4400_s20  ;;  %v2532_v52 = vmul.f32 %v4375_v53, %v1550_v50  ;;  %s3638_s27 = scalar_lea.vmem %s3637_s11, 64  ;;  %p3639_p7 = scmp.lt.s32.totalorder %s4658_s4, %s3637_s11 }
 0x355   : > { %v1623_v28 = vadd.f32 %v1622_v24, %v1619_v3  ;;  %v1698_v29 = vadd.f32 %v1696_v26, %v1692_v41  ;;  %v1618_v30 = vmul.f32 %v1616_v54, %v1595_v51  ;;  %v1646_v31 = vmul.f32 %v1644_v55, %v1595_v51  ;;  %v2946_v55 = vld [vmem:[%s4706_s6 + $0x8] sm:$0xf]  ;;  %p3640_p10 = scmp.lt.s32.totalorder %s3638_s27, %s3632_s13 }
 0x356   : > { %v2534_v16 = vadd.f32 %v2532_v52, %v2524_v7  ;;  %v1674_v32 = vmul.f32 %v1672_v39, %v1595_v51  ;;  %v1702_v17 = vmul.f32 %v1700_v34, %v1595_v51  ;;  %v2542_v33 = vmul.f32 %v4388_v35, %v1595_v51  ;;  %v2948_v39 = vld [vmem:[%s4706_s6 + $0xc] sm:$0xf] }
 0x357   : > { %v1651_v38 = vadd.f32 %v1650_v57, %v1647_v8  ;;  %v1679_v36 = vadd.f32 %v1678_v27, %v1675_v9  ;;  %v1620_v37 = vadd.f32 %v1618_v30, %v1614_v6  ;;  %v1648_v20 = vadd.f32 %v1646_v31, %v1642_v25  ;;  %v3514_v3 = vld [vmem:[%s4710_s10 + $0x8] sm:$0xff]   ;;  %p3641_p0 = por %p3640_p10, %p3639_p7 }
 0x358   : > { %v1707_v40 = vadd.f32 %v1706_v58, %v1703_v11  ;;  %v1676_v42 = vadd.f32 %v1674_v32, %v1670_v56  ;;  %v1704_v43 = vadd.f32 %v1702_v17, %v1698_v29  ;;  %v4430_v44 = vadd.f32 %v2542_v33, %v2534_v16 }
 0x359   : > { %v1624_v45 = vadd.f32 %v1622_v24, %v1620_v37  ;;  %v1652_v41 = vadd.f32 %v1650_v57, %v1648_v20  ;;  %v1625_v7 = vmax.f32 %v1623_v28, 0.0  ;;  %v1653_v47 = vmax.f32 %v1651_v38, 0.0  ;;  %v2950_v28 = vld [vmem:[%s4707_s7] ss:$0 sm:$0xff]  ;;  %p3642_p2 = pnand %p3641_p0, %p3635_p4 }
 0x35a   : > { %v1680_v46 = vadd.f32 %v1678_v27, %v1676_v42  ;;  %v1708_v54 = vadd.f32 %v1706_v58, %v1704_v43  ;;  %v2549_v34 = vpack.c.bf16 %v4430_v44, %v4412_v21  ;;  %v1681_v49 = vmax.f32 %v1679_v36, 0.0  ;;  %v3546_v21 = vld [vmem:[%s4715_s15 + $0x10] sm:$0xff]   ;;  %v3547_v44 = vld [vmem:[%s4715_s15 + $0x18] sm:$0xff]  }
 0x35b   : > { %v1626_v48 = vmax.f32 %v1624_v45, 0.0  ;;  %v1654_v12 = vmax.f32 %v1652_v41, 0.0  ;;  %v1709_v14 = vmax.f32 %v1707_v40, 0.0  ;;  %v1819_v19 = vsel %vm1720_vm4, %v2946_v55, 0 }
 0x35c   : > { %v1682_v15 = vmax.f32 %v1680_v46, 0.0  ;;  %v1710_v50 = vmax.f32 %v1708_v54, 0.0  ;;  %v1871_v59 = vsel %vm1720_vm4, %v2948_v39, 0  ;;  %v3513_v39 = vld [vmem:[%s4710_s10 + $0x40] sm:$0xff]  }
 0x35d   : > { %v1713_v51 = vpack.c.bf16 %v1654_v12, %v1653_v47  ;;  %v1711_v4 = vpack.c.bf16 %v1626_v48, %v1625_v7  ;;  %v3515_v47 = vld [vmem:[%s4710_s10 + $0x48] sm:$0xff]   ;;  %v3516_v48 = vld [vmem:[%s4710_s10 + $0x10] sm:$0xff]  }
 0x35e   : > { %v1812_v60 = vpack.c.bf16 %v1682_v15, %v1681_v49  ;;  %v1864_v61 = vpack.c.bf16 %v1710_v50, %v1709_v14  ;;  %v3517_v12 = vld [vmem:[%s4710_s10 + $0x50] sm:$0xff]   ;;  %v3518_v49 = vld [vmem:[%s4710_s10 + $0x18] sm:$0xff]   ;;  %v3520_v15 = vld [vmem:[%s4710_s10 + $0x20] sm:$0xff]  }
 0x35f   : > { %3288 = vmatmul.mubr.msk.bf16.vlgmr.msra.gmra.mrb[24].mxu0 %vm1716_vm5, %v1713_v51  ;;  %3294 = vmatmul.mubr.msk.bf16.vlgmr.msra.gmra.mrb[24].mxu1 %vm1716_vm5, %v1711_v4  ;;  %v3519_v14 = vld [vmem:[%s4710_s10 + $0x58] sm:$0xff]   ;;  %v3521_v50 = vld [vmem:[%s4710_s10 + $0x60] sm:$0xff]   ;;  %v3522_v51 = vld [vmem:[%s4710_s10 + $0x28] sm:$0xff]  }
 0x360   : > { %3298 = vmatpush3.bf16.msra.mxu0 %v1819_v19  ;;  %3304 = vmatpush3.bf16.msra.mxu1 %v1871_v59  ;;  %v3523_v4 = vld [vmem:[%s4710_s10 + $0x68] sm:$0xff]   ;;  %v3524_v19 = vld [vmem:[%s4710_s10 + $0x30] sm:$0xff]  }
 0x361   : > { %3299 = vmatprep.mubr.msk.bf16.mxu0 %vm3713_vm0, %v3712_v5  ;;  %3305 = vmatprep.mubr.msk.bf16.mxu1 %vm3713_vm0, %v3712_v5  ;;  %v3525_v59 = vld [vmem:[%s4710_s10 + $0x70] sm:$0xff]  }
 0x362   : > { %3309 = vmatprep.subr.bf16.mxu0 %v3712_v5  ;;  %3321 = vmatprep.subr.bf16.mxu1 %v3712_v5 }
 0x367   : > { %3300 = vmatmul.mubr.msk.bf16.vlgmr.msra.gmra.mrb[28].mxu0 %vm1716_vm5, %v1812_v60  ;;  %3306 = vmatmul.mubr.msk.bf16.vlgmr.msra.gmra.mrb[28].mxu1 %vm1716_vm5, %v1864_v61  ;;  %v3526_v60 = vld [vmem:[%s4710_s10 + $0x38] sm:$0xff]  }
 0x368   : > { %3317 = vmatprep.mubr.msk.bf16.mxu0 %vm3713_vm0, %v3712_v5  ;;  %3337 = vmatprep.mubr.msk.bf16.mxu1 %vm3713_vm0, %v3712_v5  ;;  %v3527_v61 = vld [vmem:[%s4710_s10 + $0x78] sm:$0xff]  }
 0x369   : > { %3310 = vmatpush3.bf16.msra.mxu0 %v3508_v62  ;;  %3322 = vmatpush3.bf16.msra.mxu1 %v3512_v2  ;;  %v2953_v62 = vld [vmem:[%s4709_s9] ss:$0 sm:$0xff] }
 0x36a   : > { %3311 = vmatprep.subr.bf16.mxu0 %v3712_v5  ;;  %3323 = vmatprep.subr.bf16.mxu1 %v3712_v5 }
 0x36d   : > { %3312 = vmatpush3.bf16.msra.mxu0 %v3509_v63  ;;  %3324 = vmatpush3.bf16.msra.mxu1 %v3514_v3 }
 0x36e   : > { %3313 = vmatprep.subr.bf16.mxu0 %v3712_v5  ;;  %3325 = vmatprep.subr.bf16.mxu1 %v3712_v5 }
 0x371   : > { %3314 = vmatpush3.bf16.msra.mxu0 %v3510_v0  ;;  %3326 = vmatpush3.bf16.msra.mxu1 %v3516_v48 }
 0x372   : > { %3315 = vmatprep.subr.bf16.mxu0 %v3712_v5  ;;  %3327 = vmatprep.subr.bf16.mxu1 %v3712_v5 }
 0x375   : > { %3316 = vmatpush3.bf16.msra.mxu0 %v3511_v1  ;;  %3328 = vmatpush3.bf16.msra.mxu1 %v3518_v49 }
 0x376   : > { %3341 = vmatprep.subr.bf16.mxu0 %v3712_v5  ;;  %3329 = vmatprep.subr.bf16.mxu1 %v3712_v5 }
 0x379   : > { %3330 = vmatpush3.bf16.msra.mxu1 %v3520_v15 }
 0x37a   : > { %3331 = vmatprep.subr.bf16.mxu1 %v3712_v5 }
 0x37d   : > { %3332 = vmatpush3.bf16.msra.mxu1 %v3522_v51 }
 0x37e   : > { %3333 = vmatprep.subr.bf16.mxu1 %v3712_v5 }
 0x381   : > { %3334 = vmatpush3.bf16.msra.mxu1 %v3524_v19 }
 0x382   : > { %3335 = vmatprep.subr.bf16.mxu1 %v3712_v5 }
 0x385   : > { %3336 = vmatpush3.bf16.msra.mxu1 %v3526_v60 }
 0x386   : > { %3361 = vmatprep.subr.bf16.mxu1 %v3712_v5 }
 0x432   : > { %v1758_v8 = vpop.f32.mrb[24].mxu0  ;;  %v1805_v9 = vpop.f32.mrb[24].mxu1 }
 0x433   : > { %v1806_v10 = vadd.f32 %v1805_v9, %v1758_v8  ;;  %v3289_v11 = vpop.f32.mrb[25].mxu0  ;;  %v3295_v22 = vpop.f32.mrb[25].mxu1 }
 0x434   : > { %v1761_v23 = vpop.f32.mrb[26].mxu0  ;;  %v1808_v24 = vpop.f32.mrb[26].mxu1 }
 0x435   : > { %v1809_v6 = vadd.f32 %v1808_v24, %v1761_v23  ;;  %v3290_v25 = vpop.f32.mrb[27].mxu0  ;;  %v3296_v56 = vpop.f32.mrb[27].mxu1 }
 0x43a   : > { %v1855_v26 = vpop.f32.mrb[28].mxu0  ;;  %v1907_v57 = vpop.f32.mrb[28].mxu1 }
 0x43b   : > { %v1862_v27 = vadd.f32 %v1855_v26, %v1806_v10  ;;  %v3301_v58 = vpop.f32.mrb[29].mxu0  ;;  %v3307_v52 = vpop.f32.mrb[29].mxu1 }
 0x43c   : > { %v1858_v29 = vpop.f32.mrb[30].mxu0  ;;  %v1910_v30 = vpop.f32.mrb[30].mxu1  ;;  %v3530_v52 = vld [vmem:[%s4710_s10 + $0x88] sm:$0xff]  }
 0x43d   : > { %v1914_v31 = vadd.f32 %v1907_v57, %v1862_v27  ;;  %v1863_v16 = vadd.f32 %v1858_v29, %v1809_v6  ;;  %v3302_v32 = vpop.f32.mrb[31].mxu0  ;;  %v3308_v17 = vpop.f32.mrb[31].mxu1  ;;  %v3528_v57 = vld [vmem:[%s4710_s10 + $0x80] sm:$0xff]   ;;  %v3532_v29 = vld [vmem:[%s4710_s10 + $0x90] sm:$0xff]  }
 0x43e   : > { %v3529_v27 = vld [vmem:[%s4710_s10 + $0xc0] sm:$0xff]  }
 0x43f   : > { %v1923_v33 = vadd.f32 %v2950_v28, %v1914_v31  ;;  %v1915_v38 = vadd.f32 %v1910_v30, %v1863_v16  ;;  %v3533_v30 = vld [vmem:[%s4710_s10 + $0xd0] sm:$0xff]   ;;  %v3534_v31 = vld [vmem:[%s4710_s10 + $0x98] sm:$0xff]   ;;  %v3536_v32 = vld [vmem:[%s4710_s10 + $0xa0] sm:$0xff]  }
 0x440   : > { %v3535_v16 = vld [vmem:[%s4710_s10 + $0xd8] sm:$0xff]   ;;  %v3537_v17 = vld [vmem:[%s4710_s10 + $0xe0] sm:$0xff]  }
 0x441   : > { %v1927_v36 = vmin.f32 %v1923_v33, 0.0  ;;  %v1924_v37 = vadd.f32 %v2950_v28, %v1915_v38  ;;  %vm1925_vm6 = vcmp.gt.f32.partialorder %v1923_v33, 0.0  ;;  %v3531_v28 = vld [vmem:[%s4710_s10 + $0xc8] sm:$0xff]  }
 0x442   : > { %v3539_v38 = vld [vmem:[%s4710_s10 + $0xe8] sm:$0xff]  }
 0x443   : > { %v1929_v20 = vmul.f32 1.442695, %v1927_v36  ;;  %v1928_v40 = vmin.f32 %v1924_v37, 0.0  ;;  %vm1926_vm7 = vcmp.gt.f32.partialorder %v1924_v37, 0.0  ;;  %v3540_v36 = vld [vmem:[%s4710_s10 + $0xb0] sm:$0xff]  }
 0x445   : > { %3548 = vpow2.f32 %v1929_v20  ;;  %v1931_v42 = vmul.f32 1.442695, %v1928_v40  ;;  %v3542_v20 = vld [vmem:[%s4710_s10 + $0xb8] sm:$0xff]  }
 0x446   : > { %v3543_v40 = vld [vmem:[%s4710_s10 + $0xf8] sm:$0xff]  }
 0x447   : > { %3550 = vpow2.f32 %v1931_v42  ;;  %v2550_v42 = vld [vmem:[%s4714_s14] sm:$0xf] }
 0x44f   : > { %v3549_v43 = vpop.eup %3548 }
 0x450   : > { %v2951_v45 = vadd.f32 -1.0, %v3549_v43  ;;  %v2632_v43 = vsel %vm1720_vm4, %v2550_v42, 0 }
 0x451   : > { %v3551_v41 = vpop.eup %3550 }
 0x452   : > { %v2952_v46 = vadd.f32 -1.0, %v3551_v41  ;;  %v1935_v54 = vsel %vm1925_vm6, %v1923_v33, %v2951_v45  ;;  %v3538_v33 = vld [vmem:[%s4710_s10 + $0xa8] sm:$0xff]   ;;  %v3544_v45 = vld [vmem:[%s4715_s15] sm:$0xff]  }
 0x453   : > { %v3545_v41 = vld [vmem:[%s4715_s15 + $0x8] sm:$0xff]  }
 0x454   : > { %v1936_v55 = vsel %vm1926_vm7, %v1924_v37, %v2952_v46  ;;  %v3541_v37 = vld [vmem:[%s4710_s10 + $0xf0] sm:$0xff]   ;;  %v2171_v46 = vstv %s2987_s21 }
 0x455   : > { %v1937_v7 = vpack.c.bf16 %v1936_v55, %v1935_v54 }
 0x457   : > { %3318 = vmatmul.mubr.msk.bf16.vlgmr.msra.gmra.mrb[32].mxu0 %vm809_vm1, %v1937_v7 }
 0x458   : > { %3342 = vmatpush3.bf16.msra.mxu0 %v3513_v39  ;;  %3357 = vmatprep.mubr.msk.bf16.mxu0 %vm3713_vm0, %v3712_v5 }
 0x459   : > { %3343 = vmatprep.subr.bf16.mxu0 %v3712_v5 }
 0x45c   : > { %3344 = vmatpush3.bf16.msra.mxu0 %v3515_v47 }
 0x45d   : > { %3345 = vmatprep.subr.bf16.mxu0 %v3712_v5 }
 0x460   : > { %3346 = vmatpush3.bf16.msra.mxu0 %v3517_v12 }
 0x461   : > { %3347 = vmatprep.subr.bf16.mxu0 %v3712_v5 }
 0x464   : > { %3348 = vmatpush3.bf16.msra.mxu0 %v3519_v14 }
 0x465   : > { %3349 = vmatprep.subr.bf16.mxu0 %v3712_v5 }
 0x468   : > { %3350 = vmatpush3.bf16.msra.mxu0 %v3521_v50 }
 0x469   : > { %3351 = vmatprep.subr.bf16.mxu0 %v3712_v5 }
 0x46c   : > { %3352 = vmatpush3.bf16.msra.mxu0 %v3523_v4 }
 0x46d   : > { %3353 = vmatprep.subr.bf16.mxu0 %v3712_v5 }
 0x470   : > { %3354 = vmatpush3.bf16.msra.mxu0 %v3525_v59 }
 0x471   : > { %3355 = vmatprep.subr.bf16.mxu0 %v3712_v5 }
 0x474   : > { %3356 = vmatpush3.bf16.msra.mxu0 %v3527_v61 }
 0x475   : > { %3381 = vmatprep.subr.bf16.mxu0 %v3712_v5 }
 0x52a   : > { %v2014_v63 = vpop.f32.mrb[32].mxu0 }
 0x52b   : > { %v2015_v0 = vadd.f32 %v2953_v62, %v2014_v63  ;;  %v3319_v1 = vpop.f32.mrb[33].mxu0 }
 0x52c   : > { %v2017_v2 = vpop.f32.mrb[34].mxu0 }
 0x52d   : > { %v2023_v3 = vmin.f32 %v2015_v0, 0.0  ;;  %v2018_v8 = vadd.f32 %v2953_v62, %v2017_v2  ;;  %v3320_v9 = vpop.f32.mrb[35].mxu0  ;;  %vm2021_vm8 = vcmp.gt.f32.partialorder %v2015_v0, 0.0 }
 0x52f   : > { %v2025_v10 = vmul.f32 1.442695, %v2023_v3  ;;  %v2024_v11 = vmin.f32 %v2018_v8, 0.0  ;;  %vm2022_vm9 = vcmp.gt.f32.partialorder %v2018_v8, 0.0 }
 0x531   : > { %3552 = vpow2.f32 %v2025_v10  ;;  %v2027_v22 = vmul.f32 1.442695, %v2024_v11 }
 0x533   : > { %3554 = vpow2.f32 %v2027_v22 }
 0x53b   : > { %v3553_v23 = vpop.eup %3552 }
 0x53c   : > { %v2959_v24 = vadd.f32 -1.0, %v3553_v23 }
 0x53d   : > { %v3555_v6 = vpop.eup %3554 }
 0x53e   : > { %v2960_v25 = vadd.f32 -1.0, %v3555_v6  ;;  %v2031_v56 = vsel %vm2021_vm8, %v2015_v0, %v2959_v24 }
 0x540   : > { %v2032_v26 = vsel %vm2022_vm9, %v2018_v8, %v2960_v25 }
 0x541   : > { %v2033_v58 = vpack.c.bf16 %v2032_v26, %v2031_v56 }
 0x543   : > { %3338 = vmatmul.mubr.bf16.vlgmr.msra.gmra.mrb[32].mxu1 %v2033_v58  ;;  %3358 = vmatmul.mubr.bf16.vlgmr.msra.gmra.mrb[36].mxu0 %v2033_v58 }
 0x544   : > { %3362 = vmatpush3.bf16.msra.mxu1 %v3528_v57  ;;  %3382 = vmatpush3.bf16.msra.mxu0 %v3529_v27 }
 0x545   : > { %3363 = vmatprep.subr.bf16.mxu1 %v3712_v5  ;;  %3383 = vmatprep.subr.bf16.mxu0 %v3712_v5 }
 0x546   : > { %3377 = vmatprep.mubr.msk.bf16.mxu1 %vm3713_vm0, %v3712_v5  ;;  %3397 = vmatprep.mubr.msk.bf16.mxu0 %vm3713_vm0, %v3712_v5 }
 0x548   : > { %3364 = vmatpush3.bf16.msra.mxu1 %v3530_v52  ;;  %3384 = vmatpush3.bf16.msra.mxu0 %v3531_v28  ;;  %v2291_v52 = vstv %s3014_s29  ;;  %v2411_v28 = vstv %s3041_s2 }
 0x549   : > { %3365 = vmatprep.subr.bf16.mxu1 %v3712_v5  ;;  %3385 = vmatprep.subr.bf16.mxu0 %v3712_v5 }
 0x54c   : > { %3366 = vmatpush3.bf16.msra.mxu1 %v3532_v29  ;;  %3386 = vmatpush3.bf16.msra.mxu0 %v3533_v30 }
 0x54d   : > { %3367 = vmatprep.subr.bf16.mxu1 %v3712_v5  ;;  %3387 = vmatprep.subr.bf16.mxu0 %v3712_v5 }
 0x550   : > { %3368 = vmatpush3.bf16.msra.mxu1 %v3534_v31  ;;  %3388 = vmatpush3.bf16.msra.mxu0 %v3535_v16 }
 0x551   : > { %3369 = vmatprep.subr.bf16.mxu1 %v3712_v5  ;;  %3389 = vmatprep.subr.bf16.mxu0 %v3712_v5 }
 0x554   : > { %3370 = vmatpush3.bf16.msra.mxu1 %v3536_v32  ;;  %3390 = vmatpush3.bf16.msra.mxu0 %v3537_v17 }
 0x555   : > { %3371 = vmatprep.subr.bf16.mxu1 %v3712_v5  ;;  %3391 = vmatprep.subr.bf16.mxu0 %v3712_v5 }
 0x558   : > { %3372 = vmatpush3.bf16.msra.mxu1 %v3538_v33  ;;  %3392 = vmatpush3.bf16.msra.mxu0 %v3539_v38 }
 0x559   : > { %3373 = vmatprep.subr.bf16.mxu1 %v3712_v5  ;;  %3393 = vmatprep.subr.bf16.mxu0 %v3712_v5 }
 0x55c   : > { %3374 = vmatpush3.bf16.msra.mxu1 %v3540_v36  ;;  %3394 = vmatpush3.bf16.msra.mxu0 %v3541_v37 }
 0x55d   : > { %3375 = vmatprep.subr.bf16.mxu1 %v3712_v5  ;;  %3395 = vmatprep.subr.bf16.mxu0 %v3712_v5 }
 0x560   : > { %3376 = vmatpush3.bf16.msra.mxu1 %v3542_v20  ;;  %3396 = vmatpush3.bf16.msra.mxu0 %v3543_v40 }
 0x561   : > { %3413 = vmatprep.subr.bf16.mxu0 %v3712_v5  ;;  %3401 = vmatprep.subr.bf16.mxu1 %v3712_v5 }
 0x563   : > { %3378 = vmatmul.mubr.bf16.vlgmr.msra.gmra.mrb[36].mxu1 %v2033_v58  ;;  %3398 = vmatmul.mubr.bf16.vlgmr.msra.gmra.mrb[40].mxu0 %v2033_v58 }
 0x564   : > { %3414 = vmatpush3.bf16.msra.mxu0 %v2632_v43  ;;  %3415 = vmatprep.mubr.msk.bf16.mxu0 %vm3713_vm0, %v3712_v5 }
 0x565   : > { %3409 = vmatprep.mubr.msk.bf16.mxu1 %vm3713_vm0, %v3712_v5  ;;  %3402 = vmatpush3.bf16.msra.mxu1 %v3544_v45 }
 0x566   : > { %3403 = vmatprep.subr.bf16.mxu1 %v3712_v5 }
 0x569   : > { %3404 = vmatpush3.bf16.msra.mxu1 %v3545_v41 }
 0x56a   : > { %3405 = vmatprep.subr.bf16.mxu1 %v3712_v5 }
 0x56b   : > { %3416 = vmatmul.mubr.msk.bf16.vlgmr.msra.gmra.mrb[44].mxu0 %vm1716_vm5, %v2549_v34  ;;  %v2051_v34 = vstv %s2050_s23 }
 0x56d   : > { %3406 = vmatpush3.bf16.msra.mxu1 %v3546_v21 }
 0x56e   : > { %3407 = vmatprep.subr.bf16.mxu1 %v3712_v5 }
 0x571   : > { %3408 = vmatpush3.bf16.msra.mxu1 %v3547_v44 }
 0x616   : > { %v2134_v54 = vpop.f32.mrb[32].mxu1  ;;  %v2254_v55 = vpop.f32.mrb[36].mxu0 }
 0x617   : > { %v2135_v39 = vadd.f32 %v2134_v54, %v2051_v34  ;;  %v2255_v7 = vadd.f32 %v2254_v55, %v2171_v46  ;;  %v3339_v47 = vpop.f32.mrb[33].mxu1  ;;  %v3359_v48 = vpop.f32.mrb[37].mxu0 }
 0x618   : > { %v2137_v12 = vpop.f32.mrb[34].mxu1  ;;  %v2257_v49 = vpop.f32.mrb[38].mxu0 }
 0x619   : > { %v2143_v14 = vmin.f32 %v2135_v39, 0.0  ;;  %v2263_v15 = vmin.f32 %v2255_v7, 0.0  ;;  %v3340_v5 = vpop.f32.mrb[35].mxu1  ;;  %v3360_v50 = vpop.f32.mrb[39].mxu0  ;;  %v2138_v51 = vadd.f32 %v2137_v12, %v2051_v34  ;;  %v2258_v4 = vadd.f32 %v2257_v49, %v2171_v46 }
 0x61a   : > { %vm2141_vm10 = vcmp.gt.f32.partialorder %v2135_v39, 0.0  ;;  %vm2261_vm11 = vcmp.gt.f32.partialorder %v2255_v7, 0.0 }
 0x61b   : > { %v2145_v19 = vmul.f32 1.442695, %v2143_v14  ;;  %v2265_v59 = vmul.f32 1.442695, %v2263_v15  ;;  %v2144_v60 = vmin.f32 %v2138_v51, 0.0  ;;  %v2264_v61 = vmin.f32 %v2258_v4, 0.0 }
 0x61c   : > { %vm2142_vm12 = vcmp.gt.f32.partialorder %v2138_v51, 0.0  ;;  %vm2262_vm13 = vcmp.gt.f32.partialorder %v2258_v4, 0.0 }
 0x61d   : > { %3556 = vpow2.f32 %v2145_v19  ;;  %v2147_v62 = vmul.f32 1.442695, %v2144_v60  ;;  %v2267_v63 = vmul.f32 1.442695, %v2264_v61 }
 0x61e   : > { %3558 = vpow2.f32 %v2265_v59 }
 0x61f   : > { %3560 = vpow2.f32 %v2147_v62 }
 0x620   : > { %3562 = vpow2.f32 %v2267_v63 }
 0x627   : > { %v3557_v0 = vpop.eup %3556 }
 0x628   : > { %v3559_v1 = vpop.eup %3558  ;;  %v2969_v2 = vadd.f32 -1.0, %v3557_v0 }
 0x629   : > { %v2996_v3 = vadd.f32 -1.0, %v3559_v1  ;;  %v3561_v8 = vpop.eup %3560 }
 0x62a   : > { %v2151_v9 = vsel %vm2141_vm10, %v2135_v39, %v2969_v2  ;;  %v3563_v10 = vpop.eup %3562  ;;  %v2970_v23 = vadd.f32 -1.0, %v3561_v8  ;;  %v2676_v8 = vstv %s2675_s30 }
 0x62b   : > { %v2517_v11 = vmul.f32 %v4357_v13, %v2151_v9  ;;  %v2271_v22 = vsel %vm2261_vm11, %v2255_v7, %v2996_v3  ;;  %v2997_v6 = vadd.f32 -1.0, %v3563_v10 }
 0x62c   : > { %v2525_v24 = vmul.f32 %v4365_v18, %v2271_v22  ;;  %v2152_v25 = vsel %vm2142_vm12, %v2138_v51, %v2970_v23 }
 0x62d   : > { %v2518_v26 = vmul.f32 %v4357_v13, %v2152_v25  ;;  %v2272_v57 = vsel %vm2262_vm13, %v2258_v4, %v2997_v6 }
 0x62e   : > { %v2527_v56 = vadd.f32 %v2525_v24, %v2517_v11  ;;  %v2526_v27 = vmul.f32 %v4365_v18, %v2272_v57 }
 0x630   : > { %v2528_v58 = vadd.f32 %v2526_v27, %v2518_v26 }
 0x636   : > { %v2374_v29 = vpop.f32.mrb[36].mxu1  ;;  %v2494_v30 = vpop.f32.mrb[40].mxu0 }
 0x637   : > { %v2375_v31 = vadd.f32 %v2374_v29, %v2291_v52  ;;  %v2495_v16 = vadd.f32 %v2494_v30, %v2411_v28  ;;  %v3379_v32 = vpop.f32.mrb[37].mxu1  ;;  %v3399_v17 = vpop.f32.mrb[41].mxu0 }
 0x638   : > { %v2377_v33 = vpop.f32.mrb[38].mxu1  ;;  %v2497_v38 = vpop.f32.mrb[42].mxu0 }
 0x639   : > { %v2383_v36 = vmin.f32 %v2375_v31, 0.0  ;;  %v2503_v37 = vmin.f32 %v2495_v16, 0.0  ;;  %v3380_v20 = vpop.f32.mrb[39].mxu1  ;;  %v3400_v40 = vpop.f32.mrb[43].mxu0  ;;  %v2378_v42 = vadd.f32 %v2377_v33, %v2291_v52  ;;  %v2498_v13 = vadd.f32 %v2497_v38, %v2411_v28 }
 0x63a   : > { %vm2381_vm14 = vcmp.gt.f32.partialorder %v2375_v31, 0.0  ;;  %vm2501_vm15 = vcmp.gt.f32.partialorder %v2495_v16, 0.0 }
 0x63b   : > { %v2385_v43 = vmul.f32 1.442695, %v2383_v36  ;;  %v2505_v45 = vmul.f32 1.442695, %v2503_v37  ;;  %v2384_v18 = vmin.f32 %v2378_v42, 0.0  ;;  %v2504_v41 = vmin.f32 %v2498_v13, 0.0 }
 0x63c   : > { %vm2382_vm0 = vcmp.gt.f32.partialorder %v2378_v42, 0.0  ;;  %vm2502_vm2 = vcmp.gt.f32.partialorder %v2498_v13, 0.0 }
 0x63d   : > { %3564 = vpow2.f32 %v2385_v43  ;;  %v2387_v21 = vmul.f32 1.442695, %v2384_v18  ;;  %v2507_v44 = vmul.f32 1.442695, %v2504_v41 }
 0x63e   : > { %3566 = vpow2.f32 %v2505_v45  ;;  %v2668_v34 = vpop.f32.mrb[44].mxu0 }
 0x63f   : > { %v3417_v46 = vpop.f32.mrb[45].mxu0  ;;  %3568 = vpow2.f32 %v2387_v21 }
 0x640   : > { %v2671_v54 = vpop.f32.mrb[46].mxu0  ;;  %3570 = vpow2.f32 %v2507_v44 }
 0x641   : > { %v3418_v55 = vpop.f32.mrb[47].mxu0 }
 0x647   : > { %v3565_v39 = vpop.eup %3564 }
 0x648   : > { %v3567_v7 = vpop.eup %3566  ;;  %v3023_v47 = vadd.f32 -1.0, %v3565_v39 }
 0x649   : > { %v3050_v48 = vadd.f32 -1.0, %v3567_v7  ;;  %v3569_v12 = vpop.eup %3568 }
 0x64a   : > { %v2391_v49 = vsel %vm2381_vm14, %v2375_v31, %v3023_v47  ;;  %v3571_v14 = vpop.eup %3570  ;;  %v3024_v50 = vadd.f32 -1.0, %v3569_v12 }
 0x64b   : > { %v2535_v15 = vmul.f32 %v4375_v53, %v2391_v49  ;;  %v2511_v5 = vsel %vm2501_vm15, %v2495_v16, %v3050_v48  ;;  %v3051_v51 = vadd.f32 -1.0, %v3571_v14 }
 0x64c   : > { %v2545_v19 = vmul.f32 %v4388_v35, %v2511_v5  ;;  %v2392_v59 = vsel %vm2382_vm0, %v2378_v42, %v3024_v50 }
 0x64d   : > { %v2537_v4 = vadd.f32 %v2535_v15, %v2527_v56  ;;  %v2536_v60 = vmul.f32 %v4375_v53, %v2392_v59  ;;  %v2512_v61 = vsel %vm2502_vm2, %v2498_v13, %v3051_v51 }
 0x64e   : > { %v2546_v0 = vmul.f32 %v4388_v35, %v2512_v61 }
 0x64f   : > { %v2547_v62 = vadd.f32 %v2545_v19, %v2537_v4  ;;  %v2538_v63 = vadd.f32 %v2536_v60, %v2528_v58 }
 0x651   : > { %v2548_v1 = vadd.f32 %v2546_v0, %v2538_v63 }
 0x653   : > { %v2551_v2 = vpack.c.bf16 %v2548_v1, %v2547_v62 }
 0x655   : > { %3410 = vmatmul.mubr.msk.bf16.vlgmr.msra.gmra.mrb[40].mxu1 %vm809_vm1, %v2551_v2 }
 0x728   : > { %v2621_v3 = vpop.f32.mrb[40].mxu1 }
 0x729   : > { %v2669_v9 = vadd.f32 %v2668_v34, %v2621_v3  ;;  %v3411_v10 = vpop.f32.mrb[41].mxu1 }
 0x72a   : > { %v2624_v11 = vpop.f32.mrb[42].mxu1 }
 0x72b   : > { %v2677_v22 = vadd.f32 %v2676_v8, %v2669_v9  ;;  %v2672_v23 = vadd.f32 %v2671_v54, %v2624_v11  ;;  %v3412_v24 = vpop.f32.mrb[43].mxu1 }
 0x72d   : > { %v2679_v53 = vsel %vm809_vm1, %v2677_v22, 0.0  ;;  %v2678_v6 = vadd.f32 %v2676_v8, %v2672_v23 }
 0x72e   : > { %v2680_v25 = vrot.slane %v2679_v53, 4 }
 0x72f   : > { %v2686_v35 = vsel %vm809_vm1, %v2678_v6, 0.0  ;;  %vm2701_vm1 = vcmask 517120  }
 0x730   : > { %v2681_v56 = vadd.f32 %v2680_v25, %v2679_v53  ;;  %v2687_v26 = vrot.slane %v2686_v35, 4 }
 0x732   : > { %v2682_v57 = vrot.slane %v2681_v56, 2  ;;  %v2688_v27 = vadd.f32 %v2687_v26, %v2686_v35 }
 0x734   : > { %v2683_v58 = vadd.f32 %v2682_v57, %v2681_v56  ;;  %v2689_v52 = vrot.slane %v2688_v27, 2 }
 0x736   : > { %v2684_v28 = vrot.slane %v2683_v58, 1  ;;  %v2690_v29 = vadd.f32 %v2689_v52, %v2688_v27 }
 0x738   : > { %v2685_v30 = vadd.f32 %v2684_v28, %v2683_v58  ;;  %v2691_v31 = vrot.slane %v2690_v29, 1 }
 0x73a   : > { %v2692_v16 = vadd.f32 %v2691_v31, %v2690_v29  ;;  %v2694_v32 = vmul.f32 0.125, %v2685_v30 }
 0x73c   : > { %v2695_v17 = vmul.f32 0.125, %v2692_v16 }
 0x73e   : > { %v2699_v33 = vsel %vm2698_vm3, %v2695_v17, %v2694_v32 }
 0x73f   : > { %2702 = vst.msk [vmem:[%s642_s0] sm:$0x3] %vm2701_vm1, %v2699_v33 }
 0x740   : > { %3645 = shalt.err (!%p3642_p2)
}
 0x741   : > { %s3646_s28 = scalar_lea.hbm %s4656_s17, 32  ;;  %s3650_s21 = scalar_lea.hbm %s4759_s16, 64 }
 0x742   : > { %p3647_p8 = scmp.ne.s32.totalorder %s4656_s17, %s3646_s28  ;;  %p3651_p12 = scmp.lt.u32.totalorder %s4656_s17, %s4759_s16 }
 0x743   : > { %p3652_p9 = scmp.lt.u32.totalorder %s3650_s21, %s3646_s28  ;;  %p3654_p3 = scmp.lt.u32.totalorder %s3646_s28, %s4656_s17 }
 0x744   : > { %p3648_p5 = pnand %p3647_p8, %p4760_p1 }
 0x745   : > { %p3653_p13 = por %p3652_p9, %p3651_p12 }
 0x746   : > { %p3649_p6 = pneg %p3648_p5 }
 0x747   : > { %p3655_p4 = por %p3654_p3, %p3653_p13 }
 0x749   : > { %p3656_p7 = pnand %p3655_p4, %p3649_p6 }
 0x74b   : > { %3659 = shalt.err (!%p3656_p7)
}
 0x74c   : > { %3435 = dma.vmem_to_hbm [thread:$0]  (%p4760_p1), %s4658_s4, 32, %s4656_s17, %s2704_s1  }
 0x74d PF: > { %s4761_s30 = sld [smem:[#allocation17_spill]]  ;;  %s4762_s19 = sld [smem:[#allocation20_spill]] }
 0x753   : > { %s2729_s22 = sand.u32 1, %s4761_s30   ;;  %p4763_p10 = scmp.ne.s32.totalorder %s4762_s19, 0 }
 0x754   : > { %s2730_s0 = scalar_lea.sflag [#allocation5], %s2729_s22 }
 0x755   : > { %p3451_p0 = pnand %p2829_p11, %p4763_p10 }
 0x757   : > { %3689 = dma.done.wait (!%p3451_p0), %s2730_s0, 32  }
 0x758   : > { %3691 = vsyncadd (!%p3451_p0), %s2730_s0, 4294967264  ;;  %s4764_s26 = sld [smem:[#allocation18_spill]]  ;;  %s4765_s5 = sld [smem:[#allocation19_spill]] }
 0x759   : > { %s4766_s23 = smov %s3698_s24  ;;  %s4767_s24 = smov %s3702_s25 }
 0x75e   : > { %p30_p2 = scmp.ge.s32.totalorder %s4764_s26, 4   ;;  %s4768_s25 = smov %s4765_s5 }
 0x760   :  { %32 = sbr.rel (!%p30_p2) target bundleno = 17 (0x11), region = 191 }
 0x767   :  { %2735 = vsyncpa [#allocation5], 1 }
 0x768   :  { %2737 = vsyncpa [#allocation5 + $0x1], 1 }
 0x769   :  { %2738 = vsyncpa [#allocation6], 1 }
 0x76a   :  { %2740 = vsyncpa [#allocation6 + $0x1], 1 }
 0x76b   :  { %2741 = vsyncpa [#allocation8], 1 }
 0x76c   :  { %2742 = vsyncpa [#allocation11], 1 }

</bundles_post_ra>
